<compile_context>
chip_gen: v7x
topology: tpu7x:2x2x1
jax: 0.10.0
libtpu: 0.0.40
codegen_flags: <defaults>
</compile_context>

<pallas_src>
import numpy as np

import jax
import jax.numpy as jnp
from jax import lax
from jax.experimental import pallas as pl
from jax.experimental.pallas import tpu as pltpu

NEG_INF = -1e30
BT = 8               # images per grid step (multiple of 8 -> sublane-tile aligned)


# ---------------------------------------------------------------------------
# The single fused kernel (processes BT images per grid step)
# ---------------------------------------------------------------------------
def _net_kernel(x_ref, w1_ref, b1_ref, w2_ref, b2_ref,
                wfc1_ref, bfc1_ref, wfc2_ref, bfc2_ref, wfc3_ref, bfc3_ref,
                o_ref):
    f32, bf16 = jnp.float32, jnp.bfloat16
    bt = o_ref.shape[0]

    x = x_ref[...]                                   # [32*bt, 96]  rows = h*bt+b, lanes = ci*32+w

    # ---- conv1 (5x5, 3->6) + ReLU + 2x2 maxpool ----------------------------------
    # lanes of acc1: even output cols -> 0..83, odd output cols -> 128..211 (rest zero)
    acc1 = jnp.zeros((28 * bt, 256), f32)
    for kh in range(5):                              # sublane offsets kh*bt are multiples of 8
        xs = x[kh * bt: kh * bt + 28 * bt, :].astype(bf16)
        acc1 = acc1 + jnp.dot(xs, w1_ref[kh], preferred_element_type=f32)
    c1 = jnp.maximum(jnp.maximum(acc1[:, :128], acc1[:, 128:]) + b1_ref[...], 0.0)  # [28*bt,128]
    c1 = c1.reshape(14, 2, bt, 128)                  # pool H: max over adjacent oh pairs
    p1 = jnp.maximum(c1[:, 0], c1[:, 1]).reshape(14 * bt, 128)   # lanes = ow1*6+c (0..83), 0 pad

    # ---- conv2 (5x5, 6->16) + ReLU + 2x2 maxpool ---------------------------------
    acc2 = jnp.zeros((10 * bt, 256), f32)
    for kh in range(5):
        ps = p1[kh * bt: kh * bt + 10 * bt, :].astype(bf16)
        acc2 = acc2 + jnp.dot(ps, w2_ref[kh], preferred_element_type=f32)
    c2 = jnp.maximum(jnp.maximum(acc2[:, :128], acc2[:, 128:]) + b2_ref[...], 0.0)  # [10*bt,128]
    c2 = c2.reshape(5, 2, bt, 128)
    p2 = jnp.maximum(c2[:, 0], c2[:, 1]).reshape(5 * bt, 128)    # lanes = ow2*16+c (0..79), 0 pad

    # ---- fc1 -> fc2 -> fc3 -> softmax (all in VMEM) ------------------------------
    # lane-concat the 5 pooled-row blocks into a [bt, 640] slab -> one K=640 matmul
    feat = jnp.concatenate([p2[r * bt:(r + 1) * bt, :] for r in range(5)], axis=1)
    h = jnp.dot(feat.astype(bf16), wfc1_ref[...], preferred_element_type=f32)
    h = jnp.maximum(h + bfc1_ref[...], 0.0)                      # [bt, 128] (120 used)
    h = jnp.dot(h.astype(bf16), wfc2_ref[...], preferred_element_type=f32)
    h = jnp.maximum(h + bfc2_ref[...], 0.0)                      # [bt, 128] (84 used)
    logits = jnp.dot(h.astype(bf16), wfc3_ref[...], preferred_element_type=f32) + bfc3_ref[...]

    m = jnp.max(logits, axis=-1, keepdims=True)      # pad lanes have -1e30 bias -> exp == 0
    e = jnp.exp(logits - m)
    inv = pl.reciprocal(jnp.sum(e, axis=-1, keepdims=True), approx=True)
    o_ref[...] = (e * inv).astype(o_ref.dtype)


# ---------------------------------------------------------------------------
# Host-side (one-time) weight preparation: torch-layout params -> kernel operands
# ---------------------------------------------------------------------------
def prepare_params(p):
    w1 = np.asarray(p["w1"], np.float32)             # [6, 3, 5, 5]
    b1 = np.asarray(p["b1"], np.float32)
    w2 = np.asarray(p["w2"], np.float32)             # [16, 6, 5, 5]
    b2 = np.asarray(p["b2"], np.float32)
    wfc1 = np.asarray(p["wfc1"], np.float32)         # [120, 400]
    bfc1 = np.asarray(p["bfc1"], np.float32)
    wfc2 = np.asarray(p["wfc2"], np.float32)         # [84, 120]
    bfc2 = np.asarray(p["bfc2"], np.float32)
    wfc3 = np.asarray(p["wfc3"], np.float32)         # [10, 84]
    bfc3 = np.asarray(p["bfc3"], np.float32)

    # conv1: W1[kh][ci*32 + (ow+kw), half*128 + j*6 + co] = w1[co, ci, kh, kw], ow = 2*j + half
    W1 = np.zeros((5, 96, 256), np.float32)
    for kh in range(5):
        for kw in range(5):
            for j in range(14):
                for half in range(2):
                    w = 2 * j + half + kw
                    col = half * 128 + j * 6
                    W1[kh, np.arange(3) * 32 + w, col:col + 6] = w1[:, :, kh, kw].T   # [ci, co]
    b1pad = np.zeros((1, 128), np.float32); b1pad[0, :84] = np.tile(b1, 14)

    # conv2: W2[kh][(ow+kw)*6 + ci, half*128 + j*16 + co] = w2[co, ci, kh, kw], ow = 2*j + half
    W2 = np.zeros((5, 128, 256), np.float32)
    for kh in range(5):
        for kw in range(5):
            for j in range(5):
                for half in range(2):
                    row = (2 * j + half + kw) * 6
                    col = half * 128 + j * 16
                    W2[kh, row:row + 6, col:col + 16] = w2[:, :, kh, kw].T            # [ci, co]
    b2pad = np.zeros((1, 128), np.float32); b2pad[0, :80] = np.tile(b2, 5)

    # fc1 over the [bt, 5*128] slab: slab lane r*128 + ow*16 + co  <->  torch co*25 + r*5 + ow
    Wfc1 = np.zeros((640, 128), np.float32)
    wfc1_4 = wfc1.reshape(120, 16, 5, 5)              # [n, co, oh, ow]
    for r in range(5):
        for ow in range(5):
            Wfc1[r * 128 + ow * 16: r * 128 + ow * 16 + 16, :120] = wfc1_4[:, :, r, ow].T
    bfc1pad = np.zeros((1, 128), np.float32); bfc1pad[0, :120] = bfc1

    Wfc2 = np.zeros((128, 128), np.float32); Wfc2[:120, :84] = wfc2.T
    bfc2pad = np.zeros((1, 128), np.float32); bfc2pad[0, :84] = bfc2
    Wfc3 = np.zeros((128, 128), np.float32); Wfc3[:84, :10] = wfc3.T
    bfc3pad = np.full((1, 128), NEG_INF, np.float32); bfc3pad[0, :10] = bfc3

    # matmul operands as bf16 (MXU), biases stay f32 (VPU/EUP math stays f32)
    return (jnp.asarray(W1, jnp.bfloat16), jnp.asarray(b1pad),
            jnp.asarray(W2, jnp.bfloat16), jnp.asarray(b2pad),
            jnp.asarray(Wfc1, jnp.bfloat16), jnp.asarray(bfc1pad),
            jnp.asarray(Wfc2, jnp.bfloat16), jnp.asarray(bfc2pad),
            jnp.asarray(Wfc3, jnp.bfloat16), jnp.asarray(bfc3pad))


# ---------------------------------------------------------------------------
# Forward pass: one pallas_call over a per-batch-tile grid
# ---------------------------------------------------------------------------
def net_forward(x_nchw, prep, bt=BT):
    B = x_nchw.shape[0]
    G = -(-B // bt)                                   # cdiv
    b_pad = G * bt
    if b_pad != B:                                    # pad batch to a multiple of the tile
        x_nchw = jnp.pad(x_nchw, ((0, b_pad - B), (0, 0), (0, 0), (0, 0)))

    # NCHW [B,3,32,32] -> per-tile layout rows = h*bt + b, lanes = ci*32 + w
    xr = (x_nchw.reshape(G, bt, 3, 32, 32)
                .transpose(0, 3, 1, 2, 4)
                .reshape(G * 32 * bt, 96))

    def _resident(a):                                 # constant index_map -> weights stay in VMEM
        nd = a.ndim
        return pl.BlockSpec(a.shape, lambda g, _nd=nd: (0,) * _nd)

    flops = b_pad * (2 * 28 * 96 * 256 * 5 + 2 * 10 * 128 * 256 * 5
                     + 2 * (640 * 128 + 128 * 128 + 128 * 128))
    bytes_accessed = (xr.size * 4
                      + sum(int(a.size) * a.dtype.itemsize for a in prep)
                      + b_pad * 128 * 4)

    out = pl.pallas_call(
        _net_kernel,
        out_shape=jax.ShapeDtypeStruct((b_pad, 128), jnp.float32),
        grid=(G,),
        in_specs=[pl.BlockSpec((32 * bt, 96), lambda g: (g, 0))]
                 + [_resident(a) for a in prep],
        out_specs=pl.BlockSpec((bt, 128), lambda g: (g, 0)),
        compiler_params=pltpu.CompilerParams(dimension_semantics=("parallel",)),
        cost_estimate=pl.CostEstimate(flops=int(flops),
                                      transcendentals=int(b_pad * 128),
                                      bytes_accessed=int(bytes_accessed)),
    )(xr, *prep)
    return out[:B, :10]


# ---------------------------------------------------------------------------
# Pure-JAX reference (torch-layout params) for correctness checking
# ---------------------------------------------------------------------------
def net_reference(x, p):
    def conv(x, w, b):
        y = lax.conv_general_dilated(
            x, w, (1, 1), "VALID", dimension_numbers=("NCHW", "OIHW", "NCHW"))
        return jnp.maximum(y + b[None, :, None, None], 0.0)

    def pool(x):
        return lax.reduce_window(x, -jnp.inf, lax.max, (1, 1, 2, 2),
                                 (1, 1, 2, 2), "VALID")

    y = pool(conv(x, p["w1"], p["b1"]))
    y = pool(conv(y, p["w2"], p["b2"]))
    f = y.reshape(y.shape[0], -1)
    h = jnp.maximum(f @ p["wfc1"].T + p["bfc1"], 0.0)
    h = jnp.maximum(h @ p["wfc2"].T + p["bfc2"], 0.0)
    logits = h @ p["wfc3"].T + p["bfc3"]
    return jax.nn.softmax(logits, axis=-1)


def init_params(key):
    ks = jax.random.split(key, 10)
    s = 0.1
    return {
        "w1": jax.random.normal(ks[0], (6, 3, 5, 5), jnp.float32) * s,
        "b1": jax.random.normal(ks[1], (6,), jnp.float32) * s,
        "w2": jax.random.normal(ks[2], (16, 6, 5, 5), jnp.float32) * s,
        "b2": jax.random.normal(ks[3], (16,), jnp.float32) * s,
        "wfc1": jax.random.normal(ks[4], (120, 400), jnp.float32) * s,
        "bfc1": jax.random.normal(ks[5], (120,), jnp.float32) * s,
        "wfc2": jax.random.normal(ks[6], (84, 120), jnp.float32) * s,
        "bfc2": jax.random.normal(ks[7], (84,), jnp.float32) * s,
        "wfc3": jax.random.normal(ks[8], (10, 84), jnp.float32) * s,
        "bfc3": jax.random.normal(ks[9], (10,), jnp.float32) * s,
    }


if __name__ == "__main__":
    key = jax.random.PRNGKey(0)
    k_x, k_p = jax.random.split(key)
    # batch=16 (-> grid=(2,), both v7x TensorCores busy); 32x32 is required by the 16*5*5 flatten
    B = 16
    x = jax.random.normal(k_x, (B, 3, 32, 32), jnp.float32)
    params = init_params(k_p)

    prep = prepare_params(params)          # one-time host-side weight repacking (bf16)
    fwd = jax.jit(net_forward)

    out = jax.block_until_ready(fwd(x, prep))
    ref = jax.block_until_ready(net_reference(x, params))

    assert out.shape == (B, 10), out.shape
    assert jnp.allclose(jnp.sum(out, axis=-1), 1.0, atol=5e-3)
    # bf16 MXU operands vs f32 reference -> bf16-level tolerance on the probabilities
    assert jnp.allclose(out, ref, atol=1e-2), f"max abs err {jnp.max(jnp.abs(out - ref))}"
    print("KERNEL_OK")
</pallas_src>

<mosaic_0001>
module attributes {stable_mosaic.version = 11 : i64} {
  func.func @_net_kernel(%arg0: i32, %arg1: memref<256x96xf32, #tpu.memory_space<vmem>>, %arg2: memref<5x96x256xbf16, #tpu.memory_space<vmem>>, %arg3: memref<1x128xf32, #tpu.memory_space<vmem>>, %arg4: memref<5x128x256xbf16, #tpu.memory_space<vmem>>, %arg5: memref<1x128xf32, #tpu.memory_space<vmem>>, %arg6: memref<640x128xbf16, #tpu.memory_space<vmem>>, %arg7: memref<1x128xf32, #tpu.memory_space<vmem>>, %arg8: memref<128x128xbf16, #tpu.memory_space<vmem>>, %arg9: memref<1x128xf32, #tpu.memory_space<vmem>>, %arg10: memref<128x128xbf16, #tpu.memory_space<vmem>>, %arg11: memref<1x128xf32, #tpu.memory_space<vmem>>, %arg12: memref<8x128xf32, #tpu.memory_space<vmem>>) attributes {dimension_semantics = [#tpu.dimension_semantics<parallel>], iteration_bounds = array<i64: 2>, scalar_prefetch = 0 : i64, scratch_operands = 0 : i64, tpu.core_type = #tpu.core_type<tc>, window_params = [{transform_indices = @transform_0, window_bounds = array<i64: 256, 96>}, {pipeline_mode = #tpu.pipeline_mode<synchronous>, transform_indices = @transform_1, window_bounds = array<i64: 5, 96, 256>}, {pipeline_mode = #tpu.pipeline_mode<synchronous>, transform_indices = @transform_2, window_bounds = array<i64: 1, 128>}, {pipeline_mode = #tpu.pipeline_mode<synchronous>, transform_indices = @transform_3, window_bounds = array<i64: 5, 128, 256>}, {pipeline_mode = #tpu.pipeline_mode<synchronous>, transform_indices = @transform_4, window_bounds = array<i64: 1, 128>}, {pipeline_mode = #tpu.pipeline_mode<synchronous>, transform_indices = @transform_5, window_bounds = array<i64: 640, 128>}, {pipeline_mode = #tpu.pipeline_mode<synchronous>, transform_indices = @transform_6, window_bounds = array<i64: 1, 128>}, {pipeline_mode = #tpu.pipeline_mode<synchronous>, transform_indices = @transform_7, window_bounds = array<i64: 128, 128>}, {pipeline_mode = #tpu.pipeline_mode<synchronous>, transform_indices = @transform_8, window_bounds = array<i64: 1, 128>}, {pipeline_mode = #tpu.pipeline_mode<synchronous>, transform_indices = @transform_9, window_bounds = array<i64: 128, 128>}, {pipeline_mode = #tpu.pipeline_mode<synchronous>, transform_indices = @transform_10, window_bounds = array<i64: 1, 128>}, {transform_indices = @transform_11, window_bounds = array<i64: 8, 128>}]} {
    %c0 = arith.constant 0 : index
    %c0_0 = arith.constant 0 : index
    %0 = vector.load %arg1[%c0, %c0_0] : memref<256x96xf32, #tpu.memory_space<vmem>>, vector<256x96xf32>
    %cst = arith.constant 0.000000e+00 : f32
    %1 = vector.broadcast %cst : f32 to vector<224x256xf32>
    %2 = vector.extract_strided_slice %0 {offsets = [0, 0], sizes = [224, 96], strides = [1, 1]} : vector<256x96xf32> to vector<224x96xf32>
    %3 = arith.truncf %2 : vector<224x96xf32> to vector<224x96xbf16>
    %c0_1 = arith.constant 0 : index
    %c0_2 = arith.constant 0 : index
    %c0_3 = arith.constant 0 : index
    %4 = vector.load %arg2[%c0_1, %c0_2, %c0_3] : memref<5x96x256xbf16, #tpu.memory_space<vmem>>, vector<1x96x256xbf16>
    %5 = vector.shape_cast %4 : vector<1x96x256xbf16> to vector<96x256xbf16>
    %cst_4 = arith.constant dense<0.000000e+00> : vector<224x256xf32>
    %6 = tpu.matmul %3, %5, %cst_4 {dimension_numbers = #tpu.dot_dimension_numbers<[1], [0], [0], [1], [0, 0, 1, 1], [], []>} : vector<224x96xbf16>, vector<96x256xbf16>, vector<224x256xf32> -> vector<224x256xf32>
    %7 = arith.addf %1, %6 : vector<224x256xf32>
    %8 = vector.extract_strided_slice %0 {offsets = [8, 0], sizes = [224, 96], strides = [1, 1]} : vector<256x96xf32> to vector<224x96xf32>
    %9 = arith.truncf %8 : vector<224x96xf32> to vector<224x96xbf16>
    %c1 = arith.constant 1 : index
    %c0_5 = arith.constant 0 : index
    %c0_6 = arith.constant 0 : index
    %10 = vector.load %arg2[%c1, %c0_5, %c0_6] : memref<5x96x256xbf16, #tpu.memory_space<vmem>>, vector<1x96x256xbf16>
    %11 = vector.shape_cast %10 : vector<1x96x256xbf16> to vector<96x256xbf16>
    %cst_7 = arith.constant dense<0.000000e+00> : vector<224x256xf32>
    %12 = tpu.matmul %9, %11, %cst_7 {dimension_numbers = #tpu.dot_dimension_numbers<[1], [0], [0], [1], [0, 0, 1, 1], [], []>} : vector<224x96xbf16>, vector<96x256xbf16>, vector<224x256xf32> -> vector<224x256xf32>
    %13 = arith.addf %7, %12 : vector<224x256xf32>
    %14 = vector.extract_strided_slice %0 {offsets = [16, 0], sizes = [224, 96], strides = [1, 1]} : vector<256x96xf32> to vector<224x96xf32>
    %15 = arith.truncf %14 : vector<224x96xf32> to vector<224x96xbf16>
    %c2 = arith.constant 2 : index
    %c0_8 = arith.constant 0 : index
    %c0_9 = arith.constant 0 : index
    %16 = vector.load %arg2[%c2, %c0_8, %c0_9] : memref<5x96x256xbf16, #tpu.memory_space<vmem>>, vector<1x96x256xbf16>
    %17 = vector.shape_cast %16 : vector<1x96x256xbf16> to vector<96x256xbf16>
    %cst_10 = arith.constant dense<0.000000e+00> : vector<224x256xf32>
    %18 = tpu.matmul %15, %17, %cst_10 {dimension_numbers = #tpu.dot_dimension_numbers<[1], [0], [0], [1], [0, 0, 1, 1], [], []>} : vector<224x96xbf16>, vector<96x256xbf16>, vector<224x256xf32> -> vector<224x256xf32>
    %19 = arith.addf %13, %18 : vector<224x256xf32>
    %20 = vector.extract_strided_slice %0 {offsets = [24, 0], sizes = [224, 96], strides = [1, 1]} : vector<256x96xf32> to vector<224x96xf32>
    %21 = arith.truncf %20 : vector<224x96xf32> to vector<224x96xbf16>
    %c3 = arith.constant 3 : index
    %c0_11 = arith.constant 0 : index
    %c0_12 = arith.constant 0 : index
    %22 = vector.load %arg2[%c3, %c0_11, %c0_12] : memref<5x96x256xbf16, #tpu.memory_space<vmem>>, vector<1x96x256xbf16>
    %23 = vector.shape_cast %22 : vector<1x96x256xbf16> to vector<96x256xbf16>
    %cst_13 = arith.constant dense<0.000000e+00> : vector<224x256xf32>
    %24 = tpu.matmul %21, %23, %cst_13 {dimension_numbers = #tpu.dot_dimension_numbers<[1], [0], [0], [1], [0, 0, 1, 1], [], []>} : vector<224x96xbf16>, vector<96x256xbf16>, vector<224x256xf32> -> vector<224x256xf32>
    %25 = arith.addf %19, %24 : vector<224x256xf32>
    %26 = vector.extract_strided_slice %0 {offsets = [32, 0], sizes = [224, 96], strides = [1, 1]} : vector<256x96xf32> to vector<224x96xf32>
    %27 = arith.truncf %26 : vector<224x96xf32> to vector<224x96xbf16>
    %c4 = arith.constant 4 : index
    %c0_14 = arith.constant 0 : index
    %c0_15 = arith.constant 0 : index
    %28 = vector.load %arg2[%c4, %c0_14, %c0_15] : memref<5x96x256xbf16, #tpu.memory_space<vmem>>, vector<1x96x256xbf16>
    %29 = vector.shape_cast %28 : vector<1x96x256xbf16> to vector<96x256xbf16>
    %cst_16 = arith.constant dense<0.000000e+00> : vector<224x256xf32>
    %30 = tpu.matmul %27, %29, %cst_16 {dimension_numbers = #tpu.dot_dimension_numbers<[1], [0], [0], [1], [0, 0, 1, 1], [], []>} : vector<224x96xbf16>, vector<96x256xbf16>, vector<224x256xf32> -> vector<224x256xf32>
    %31 = arith.addf %25, %30 : vector<224x256xf32>
    %32 = vector.extract_strided_slice %31 {offsets = [0, 0], sizes = [224, 128], strides = [1, 1]} : vector<224x256xf32> to vector<224x128xf32>
    %33 = vector.extract_strided_slice %31 {offsets = [0, 128], sizes = [224, 128], strides = [1, 1]} : vector<224x256xf32> to vector<224x128xf32>
    %34 = arith.maximumf %32, %33 : vector<224x128xf32>
    %c0_17 = arith.constant 0 : index
    %c0_18 = arith.constant 0 : index
    %35 = vector.load %arg3[%c0_17, %c0_18] : memref<1x128xf32, #tpu.memory_space<vmem>>, vector<1x128xf32>
    %36 = vector.broadcast %35 : vector<1x128xf32> to vector<224x128xf32>
    %37 = arith.addf %34, %36 : vector<224x128xf32>
    %cst_19 = arith.constant 0.000000e+00 : f32
    %38 = vector.broadcast %cst_19 : f32 to vector<224x128xf32>
    %39 = arith.maximumf %37, %38 : vector<224x128xf32>
    %40 = vector.shape_cast %39 : vector<224x128xf32> to vector<14x2x8x128xf32>
    %41 = vector.extract_strided_slice %40 {offsets = [0, 0, 0, 0], sizes = [14, 1, 8, 128], strides = [1, 1, 1, 1]} : vector<14x2x8x128xf32> to vector<14x1x8x128xf32>
    %42 = vector.shape_cast %41 : vector<14x1x8x128xf32> to vector<14x8x128xf32>
    %43 = vector.extract_strided_slice %40 {offsets = [0, 1, 0, 0], sizes = [14, 1, 8, 128], strides = [1, 1, 1, 1]} : vector<14x2x8x128xf32> to vector<14x1x8x128xf32>
    %44 = vector.shape_cast %43 : vector<14x1x8x128xf32> to vector<14x8x128xf32>
    %45 = arith.maximumf %42, %44 : vector<14x8x128xf32>
    %46 = vector.shape_cast %45 : vector<14x8x128xf32> to vector<112x128xf32>
    %cst_20 = arith.constant 0.000000e+00 : f32
    %47 = vector.broadcast %cst_20 : f32 to vector<80x256xf32>
    %48 = vector.extract_strided_slice %46 {offsets = [0, 0], sizes = [80, 128], strides = [1, 1]} : vector<112x128xf32> to vector<80x128xf32>
    %49 = arith.truncf %48 : vector<80x128xf32> to vector<80x128xbf16>
    %c0_21 = arith.constant 0 : index
    %c0_22 = arith.constant 0 : index
    %c0_23 = arith.constant 0 : index
    %50 = vector.load %arg4[%c0_21, %c0_22, %c0_23] : memref<5x128x256xbf16, #tpu.memory_space<vmem>>, vector<1x128x256xbf16>
    %51 = vector.shape_cast %50 : vector<1x128x256xbf16> to vector<128x256xbf16>
    %cst_24 = arith.constant dense<0.000000e+00> : vector<80x256xf32>
    %52 = tpu.matmul %49, %51, %cst_24 {dimension_numbers = #tpu.dot_dimension_numbers<[1], [0], [0], [1], [0, 0, 1, 1], [], []>} : vector<80x128xbf16>, vector<128x256xbf16>, vector<80x256xf32> -> vector<80x256xf32>
    %53 = arith.addf %47, %52 : vector<80x256xf32>
    %54 = vector.extract_strided_slice %46 {offsets = [8, 0], sizes = [80, 128], strides = [1, 1]} : vector<112x128xf32> to vector<80x128xf32>
    %55 = arith.truncf %54 : vector<80x128xf32> to vector<80x128xbf16>
    %c1_25 = arith.constant 1 : index
    %c0_26 = arith.constant 0 : index
    %c0_27 = arith.constant 0 : index
    %56 = vector.load %arg4[%c1_25, %c0_26, %c0_27] : memref<5x128x256xbf16, #tpu.memory_space<vmem>>, vector<1x128x256xbf16>
    %57 = vector.shape_cast %56 : vector<1x128x256xbf16> to vector<128x256xbf16>
    %cst_28 = arith.constant dense<0.000000e+00> : vector<80x256xf32>
    %58 = tpu.matmul %55, %57, %cst_28 {dimension_numbers = #tpu.dot_dimension_numbers<[1], [0], [0], [1], [0, 0, 1, 1], [], []>} : vector<80x128xbf16>, vector<128x256xbf16>, vector<80x256xf32> -> vector<80x256xf32>
    %59 = arith.addf %53, %58 : vector<80x256xf32>
    %60 = vector.extract_strided_slice %46 {offsets = [16, 0], sizes = [80, 128], strides = [1, 1]} : vector<112x128xf32> to vector<80x128xf32>
    %61 = arith.truncf %60 : vector<80x128xf32> to vector<80x128xbf16>
    %c2_29 = arith.constant 2 : index
    %c0_30 = arith.constant 0 : index
    %c0_31 = arith.constant 0 : index
    %62 = vector.load %arg4[%c2_29, %c0_30, %c0_31] : memref<5x128x256xbf16, #tpu.memory_space<vmem>>, vector<1x128x256xbf16>
    %63 = vector.shape_cast %62 : vector<1x128x256xbf16> to vector<128x256xbf16>
    %cst_32 = arith.constant dense<0.000000e+00> : vector<80x256xf32>
    %64 = tpu.matmul %61, %63, %cst_32 {dimension_numbers = #tpu.dot_dimension_numbers<[1], [0], [0], [1], [0, 0, 1, 1], [], []>} : vector<80x128xbf16>, vector<128x256xbf16>, vector<80x256xf32> -> vector<80x256xf32>
    %65 = arith.addf %59, %64 : vector<80x256xf32>
    %66 = vector.extract_strided_slice %46 {offsets = [24, 0], sizes = [80, 128], strides = [1, 1]} : vector<112x128xf32> to vector<80x128xf32>
    %67 = arith.truncf %66 : vector<80x128xf32> to vector<80x128xbf16>
    %c3_33 = arith.constant 3 : index
    %c0_34 = arith.constant 0 : index
    %c0_35 = arith.constant 0 : index
    %68 = vector.load %arg4[%c3_33, %c0_34, %c0_35] : memref<5x128x256xbf16, #tpu.memory_space<vmem>>, vector<1x128x256xbf16>
    %69 = vector.shape_cast %68 : vector<1x128x256xbf16> to vector<128x256xbf16>
    %cst_36 = arith.constant dense<0.000000e+00> : vector<80x256xf32>
    %70 = tpu.matmul %67, %69, %cst_36 {dimension_numbers = #tpu.dot_dimension_numbers<[1], [0], [0], [1], [0, 0, 1, 1], [], []>} : vector<80x128xbf16>, vector<128x256xbf16>, vector<80x256xf32> -> vector<80x256xf32>
    %71 = arith.addf %65, %70 : vector<80x256xf32>
    %72 = vector.extract_strided_slice %46 {offsets = [32, 0], sizes = [80, 128], strides = [1, 1]} : vector<112x128xf32> to vector<80x128xf32>
    %73 = arith.truncf %72 : vector<80x128xf32> to vector<80x128xbf16>
    %c4_37 = arith.constant 4 : index
    %c0_38 = arith.constant 0 : index
    %c0_39 = arith.constant 0 : index
    %74 = vector.load %arg4[%c4_37, %c0_38, %c0_39] : memref<5x128x256xbf16, #tpu.memory_space<vmem>>, vector<1x128x256xbf16>
    %75 = vector.shape_cast %74 : vector<1x128x256xbf16> to vector<128x256xbf16>
    %cst_40 = arith.constant dense<0.000000e+00> : vector<80x256xf32>
    %76 = tpu.matmul %73, %75, %cst_40 {dimension_numbers = #tpu.dot_dimension_numbers<[1], [0], [0], [1], [0, 0, 1, 1], [], []>} : vector<80x128xbf16>, vector<128x256xbf16>, vector<80x256xf32> -> vector<80x256xf32>
    %77 = arith.addf %71, %76 : vector<80x256xf32>
    %78 = vector.extract_strided_slice %77 {offsets = [0, 0], sizes = [80, 128], strides = [1, 1]} : vector<80x256xf32> to vector<80x128xf32>
    %79 = vector.extract_strided_slice %77 {offsets = [0, 128], sizes = [80, 128], strides = [1, 1]} : vector<80x256xf32> to vector<80x128xf32>
    %80 = arith.maximumf %78, %79 : vector<80x128xf32>
    %c0_41 = arith.constant 0 : index
    %c0_42 = arith.constant 0 : index
    %81 = vector.load %arg5[%c0_41, %c0_42] : memref<1x128xf32, #tpu.memory_space<vmem>>, vector<1x128xf32>
    %82 = vector.broadcast %81 : vector<1x128xf32> to vector<80x128xf32>
    %83 = arith.addf %80, %82 : vector<80x128xf32>
    %cst_43 = arith.constant 0.000000e+00 : f32
    %84 = vector.broadcast %cst_43 : f32 to vector<80x128xf32>
    %85 = arith.maximumf %83, %84 : vector<80x128xf32>
    %86 = vector.shape_cast %85 : vector<80x128xf32> to vector<5x2x8x128xf32>
    %87 = vector.extract_strided_slice %86 {offsets = [0, 0, 0, 0], sizes = [5, 1, 8, 128], strides = [1, 1, 1, 1]} : vector<5x2x8x128xf32> to vector<5x1x8x128xf32>
    %88 = vector.shape_cast %87 : vector<5x1x8x128xf32> to vector<5x8x128xf32>
    %89 = vector.extract_strided_slice %86 {offsets = [0, 1, 0, 0], sizes = [5, 1, 8, 128], strides = [1, 1, 1, 1]} : vector<5x2x8x128xf32> to vector<5x1x8x128xf32>
    %90 = vector.shape_cast %89 : vector<5x1x8x128xf32> to vector<5x8x128xf32>
    %91 = arith.maximumf %88, %90 : vector<5x8x128xf32>
    %92 = vector.shape_cast %91 : vector<5x8x128xf32> to vector<40x128xf32>
    %93 = vector.extract_strided_slice %92 {offsets = [0, 0], sizes = [8, 128], strides = [1, 1]} : vector<40x128xf32> to vector<8x128xf32>
    %94 = vector.extract_strided_slice %92 {offsets = [8, 0], sizes = [8, 128], strides = [1, 1]} : vector<40x128xf32> to vector<8x128xf32>
    %95 = vector.extract_strided_slice %92 {offsets = [16, 0], sizes = [8, 128], strides = [1, 1]} : vector<40x128xf32> to vector<8x128xf32>
    %96 = vector.extract_strided_slice %92 {offsets = [24, 0], sizes = [8, 128], strides = [1, 1]} : vector<40x128xf32> to vector<8x128xf32>
    %97 = vector.extract_strided_slice %92 {offsets = [32, 0], sizes = [8, 128], strides = [1, 1]} : vector<40x128xf32> to vector<8x128xf32>
    %98 = tpu.concatenate %93, %94, %95, %96, %97 in 1 : vector<8x128xf32>, vector<8x128xf32>, vector<8x128xf32>, vector<8x128xf32>, vector<8x128xf32> -> vector<8x640xf32>
    %99 = arith.truncf %98 : vector<8x640xf32> to vector<8x640xbf16>
    %c0_44 = arith.constant 0 : index
    %c0_45 = arith.constant 0 : index
    %100 = vector.load %arg6[%c0_44, %c0_45] : memref<640x128xbf16, #tpu.memory_space<vmem>>, vector<640x128xbf16>
    %cst_46 = arith.constant dense<0.000000e+00> : vector<8x128xf32>
    %101 = tpu.matmul %99, %100, %cst_46 {dimension_numbers = #tpu.dot_dimension_numbers<[1], [0], [0], [1], [0, 0, 1, 1], [], []>} : vector<8x640xbf16>, vector<640x128xbf16>, vector<8x128xf32> -> vector<8x128xf32>
    %c0_47 = arith.constant 0 : index
    %c0_48 = arith.constant 0 : index
    %102 = vector.load %arg7[%c0_47, %c0_48] : memref<1x128xf32, #tpu.memory_space<vmem>>, vector<1x128xf32>
    %103 = vector.broadcast %102 : vector<1x128xf32> to vector<8x128xf32>
    %104 = arith.addf %101, %103 : vector<8x128xf32>
    %cst_49 = arith.constant 0.000000e+00 : f32
    %105 = vector.broadcast %cst_49 : f32 to vector<8x128xf32>
    %106 = arith.maximumf %104, %105 : vector<8x128xf32>
    %107 = arith.truncf %106 : vector<8x128xf32> to vector<8x128xbf16>
    %c0_50 = arith.constant 0 : index
    %c0_51 = arith.constant 0 : index
    %108 = vector.load %arg8[%c0_50, %c0_51] : memref<128x128xbf16, #tpu.memory_space<vmem>>, vector<128x128xbf16>
    %cst_52 = arith.constant dense<0.000000e+00> : vector<8x128xf32>
    %109 = tpu.matmul %107, %108, %cst_52 {dimension_numbers = #tpu.dot_dimension_numbers<[1], [0], [0], [1], [0, 0, 1, 1], [], []>} : vector<8x128xbf16>, vector<128x128xbf16>, vector<8x128xf32> -> vector<8x128xf32>
    %c0_53 = arith.constant 0 : index
    %c0_54 = arith.constant 0 : index
    %110 = vector.load %arg9[%c0_53, %c0_54] : memref<1x128xf32, #tpu.memory_space<vmem>>, vector<1x128xf32>
    %111 = vector.broadcast %110 : vector<1x128xf32> to vector<8x128xf32>
    %112 = arith.addf %109, %111 : vector<8x128xf32>
    %cst_55 = arith.constant 0.000000e+00 : f32
    %113 = vector.broadcast %cst_55 : f32 to vector<8x128xf32>
    %114 = arith.maximumf %112, %113 : vector<8x128xf32>
    %115 = arith.truncf %114 : vector<8x128xf32> to vector<8x128xbf16>
    %c0_56 = arith.constant 0 : index
    %c0_57 = arith.constant 0 : index
    %116 = vector.load %arg10[%c0_56, %c0_57] : memref<128x128xbf16, #tpu.memory_space<vmem>>, vector<128x128xbf16>
    %cst_58 = arith.constant dense<0.000000e+00> : vector<8x128xf32>
    %117 = tpu.matmul %115, %116, %cst_58 {dimension_numbers = #tpu.dot_dimension_numbers<[1], [0], [0], [1], [0, 0, 1, 1], [], []>} : vector<8x128xbf16>, vector<128x128xbf16>, vector<8x128xf32> -> vector<8x128xf32>
    %c0_59 = arith.constant 0 : index
    %c0_60 = arith.constant 0 : index
    %118 = vector.load %arg11[%c0_59, %c0_60] : memref<1x128xf32, #tpu.memory_space<vmem>>, vector<1x128xf32>
    %119 = vector.broadcast %118 : vector<1x128xf32> to vector<8x128xf32>
    %120 = arith.addf %117, %119 : vector<8x128xf32>
    %cst_61 = arith.constant dense<0xFF800000> : vector<8xf32>
    %121 = vector.multi_reduction <maximumf>, %120, %cst_61 [1] : vector<8x128xf32> to vector<8xf32>
    %122 = vector.shape_cast %121 : vector<8xf32> to vector<8x1xf32>
    %123 = vector.broadcast %122 : vector<8x1xf32> to vector<8x128xf32>
    %124 = arith.subf %120, %123 : vector<8x128xf32>
    %125 = math.exp %124 : vector<8x128xf32>
    %cst_62 = arith.constant dense<0.000000e+00> : vector<8xf32>
    %126 = vector.multi_reduction <add>, %125, %cst_62 [1] : vector<8x128xf32> to vector<8xf32>
    %127 = vector.shape_cast %126 : vector<8xf32> to vector<8x1xf32>
    %128 = tpu.reciprocal %127 {approx = true} : vector<8x1xf32> -> vector<8x1xf32>
    %129 = vector.broadcast %128 : vector<8x1xf32> to vector<8x128xf32>
    %130 = arith.mulf %125, %129 : vector<8x128xf32>
    %c0_63 = arith.constant 0 : index
    %c0_64 = arith.constant 0 : index
    %131 = vector.load %arg12[%c0_63, %c0_64] : memref<8x128xf32, #tpu.memory_space<vmem>>, vector<8x128xf32>
    tpu.vector_store %arg12[%c0_63, %c0_64], %130 {strides = array<i32>} : memref<8x128xf32, #tpu.memory_space<vmem>>, vector<8x128xf32>,
    return
  }
  func.func @transform_0(%arg0: i32) -> (i32, i32) {
    %c0_i32 = arith.constant 0 : i32
    %c0_i32_0 = arith.constant 0 : i32
    return %arg0, %c0_i32 : i32, i32
  }
  func.func @transform_1(%arg0: i32) -> (i32, i32, i32) {
    %c0_i32 = arith.constant 0 : i32
    %c0_i32_0 = arith.constant 0 : i32
    %c0_i32_1 = arith.constant 0 : i32
    %c0_i32_2 = arith.constant 0 : i32
    return %c0_i32, %c0_i32_0, %c0_i32_1 : i32, i32, i32
  }
  func.func @transform_2(%arg0: i32) -> (i32, i32) {
    %c0_i32 = arith.constant 0 : i32
    %c0_i32_0 = arith.constant 0 : i32
    %c0_i32_1 = arith.constant 0 : i32
    return %c0_i32, %c0_i32_0 : i32, i32
  }
  func.func @transform_3(%arg0: i32) -> (i32, i32, i32) {
    %c0_i32 = arith.constant 0 : i32
    %c0_i32_0 = arith.constant 0 : i32
    %c0_i32_1 = arith.constant 0 : i32
    %c0_i32_2 = arith.constant 0 : i32
    return %c0_i32, %c0_i32_0, %c0_i32_1 : i32, i32, i32
  }
  func.func @transform_4(%arg0: i32) -> (i32, i32) {
    %c0_i32 = arith.constant 0 : i32
    %c0_i32_0 = arith.constant 0 : i32
    %c0_i32_1 = arith.constant 0 : i32
    return %c0_i32, %c0_i32_0 : i32, i32
  }
  func.func @transform_5(%arg0: i32) -> (i32, i32) {
    %c0_i32 = arith.constant 0 : i32
    %c0_i32_0 = arith.constant 0 : i32
    %c0_i32_1 = arith.constant 0 : i32
    return %c0_i32, %c0_i32_0 : i32, i32
  }
  func.func @transform_6(%arg0: i32) -> (i32, i32) {
    %c0_i32 = arith.constant 0 : i32
    %c0_i32_0 = arith.constant 0 : i32
    %c0_i32_1 = arith.constant 0 : i32
    return %c0_i32, %c0_i32_0 : i32, i32
  }
  func.func @transform_7(%arg0: i32) -> (i32, i32) {
    %c0_i32 = arith.constant 0 : i32
    %c0_i32_0 = arith.constant 0 : i32
    %c0_i32_1 = arith.constant 0 : i32
    return %c0_i32, %c0_i32_0 : i32, i32
  }
  func.func @transform_8(%arg0: i32) -> (i32, i32) {
    %c0_i32 = arith.constant 0 : i32
    %c0_i32_0 = arith.constant 0 : i32
    %c0_i32_1 = arith.constant 0 : i32
    return %c0_i32, %c0_i32_0 : i32, i32
  }
  func.func @transform_9(%arg0: i32) -> (i32, i32) {
    %c0_i32 = arith.constant 0 : i32
    %c0_i32_0 = arith.constant 0 : i32
    %c0_i32_1 = arith.constant 0 : i32
    return %c0_i32, %c0_i32_0 : i32, i32
  }
  func.func @transform_10(%arg0: i32) -> (i32, i32) {
    %c0_i32 = arith.constant 0 : i32
    %c0_i32_0 = arith.constant 0 : i32
    %c0_i32_1 = arith.constant 0 : i32
    return %c0_i32, %c0_i32_0 : i32, i32
  }
  func.func @transform_11(%arg0: i32) -> (i32, i32) {
    %c0_i32 = arith.constant 0 : i32
    %c0_i32_0 = arith.constant 0 : i32
    return %arg0, %c0_i32 : i32, i32
  }
}

</mosaic_0001>

<bundles_post_ra>
// kernel: net_forward.1
= control target key start
LH: loop header
LB: loop body
LE: loop exit
PB: predicated region body
PF: predicated region fallthrough
CT: control target
= control target key end

     0   :  { %16 = vsyncpa [#allocation3], 0  ;;  %s6478_s0 = inlined_call_operand.vmem [shape: f32[512,96], index: 0, kind: input, shape index: {}]   ;;  %s6479_s1 = inlined_call_operand.vmem [shape: bf16[5,96,256], index: 1, kind: input, shape index: {}]   ;;  %s6480_s2 = inlined_call_operand.vmem [shape: f32[1,128], index: 2, kind: input, shape index: {}]   ;;  %s6481_s3 = inlined_call_operand.vmem [shape: bf16[5,128,256], index: 3, kind: input, shape index: {}]   ;;  %s6482_s4 = inlined_call_operand.vmem [shape: f32[1,128], index: 4, kind: input, shape index: {}]   ;;  %s6483_s5 = inlined_call_operand.vmem [shape: bf16[640,128], index: 5, kind: input, shape index: {}]   ;;  %s6484_s6 = inlined_call_operand.vmem [shape: f32[1,128], index: 6, kind: input, shape index: {}]   ;;  %s6485_s7 = inlined_call_operand.vmem [shape: bf16[128,128], index: 7, kind: input, shape index: {}]   ;;  %s6486_s8 = inlined_call_operand.vmem [shape: f32[1,128], index: 8, kind: input, shape index: {}]   ;;  %s6487_s9 = inlined_call_operand.vmem [shape: bf16[128,128], index: 9, kind: input, shape index: {}]   ;;  %s6488_s10 = inlined_call_operand.vmem [shape: f32[1,128], index: 10, kind: input, shape index: {}]   ;;  %s6489_s11 = inlined_call_operand.hbm [shape: f32[16,128], index: 11, kind: output, shape index: {}]  }
   0x1   :  { %18 = vsyncpa [#allocation3 + $0x1], 0  ;;  %s5091_s17 = smov 0   ;;  %s5093_s18 = smov 0  }
   0x2   :  { %s5095_s19 = smov 0   ;;  %s5097_s20 = smov 0  }
   0x3 LB: > { %s5112_s21 = sadd.s32 4294967295, %s5025_s20   ;;  %s3822_s22 = sadd.s32 4294967294, %s5025_s20   ;;  %s5025_s20 = sphi %s5097_s20, %s6516_s20   ;;  %s5021_s19 = sphi %s5095_s19, %s6515_s19   ;;  %s5017_s18 = sphi %s5093_s18, %s6514_s18   ;;  %s5013_s17 = sphi %s5091_s17, %s6513_s17  }
   0x4   : > { %s5116_s23 = sadd.s32 1, %s5025_s20   ;;  %s267_s24 = sadd.s32 1, %s5021_s19 }
   0x5   : > { %s264_s25 = ssub.s32 %s5025_s20, %s5116_s23  ;;  %p277_p0 = scmp.ne.s32.totalorder %s5021_s19, %s5017_s18 }
   0x6   : > { %p265_p1 = scmp.eq.s32.totalorder %s264_s25, 0  ;;  %p278_p2 = scmp.eq.s32.totalorder %s5112_s21, 1 }
   0x7   : > { %p283_p3 = scmp.ne.s32.totalorder %s5017_s18, %s5013_s17  ;;  %p284_p4 = scmp.eq.s32.totalorder %s3822_s22, 1 }
   0x8   : > { %s5127_s26 = scalar_select %p265_p1, %s5021_s19, %s267_s24  }
   0x9   : > { %p5129_p5 = por %p278_p2, %p277_p0  ;;  %p5133_p6 = por %p284_p4, %p283_p3 }
   0xa   : > { %6492 = sst [smem:[#allocation5_spill]] %s5127_s26  ;;  %p3825_p7 = scmp.ge.s32.totalorder %s5025_s20, 1 }
   0xb   : > { %p341_p8 = scmp.lt.s32.totalorder %s5025_s20, 3 }
   0xd   : > { %p342_p9 = pnand %p3825_p7, %p341_p8 }
   0xf   : > { %345 = sbr.rel (%p342_p9) target bundleno = 2093 (0x82d), region = 64 }
  0x16   : > { %v4693_v0 = vld [vmem:[%s6479_s1 + $0x4] ss:$8 sps:$4 sm:$0xff]   ;;  %s3827_s12 = sshll.u32 %s5112_s21, 5  ;;  %v4695_v1 = vld [vmem:[%s6479_s1] ss:$8 sps:$4 sm:$0xff]   ;;  %v6490_v2 = vmov 0  }
  0x17   : > { %883 = vmatprep.mubr.bf16.mxu0 %v6490_v2  ;;  %p382_p10 = scmp.lt.s32.totalorder %s3827_s12, 63  ;;  %608 = vmatprep.mubr.bf16.mxu1 %v6490_v2  ;;  %v4696_v3 = vld [vmem:[%s6479_s1 + $0x14] ss:$8 sps:$4 sm:$0xff]   ;;  %v4698_v4 = vld [vmem:[%s6479_s1 + $0x10] ss:$8 sps:$4 sm:$0xff]   ;;  %vm533_vm0 = vcmask 785408  }
  0x18   : > { %851 = vmatprep.subr.bf16.mxu0 %v4693_v0  ;;  %v4699_v5 = vld [vmem:[%s6479_s1 + $0x24] ss:$8 sps:$4 sm:$0xff]   ;;  %v4701_v6 = vld [vmem:[%s6479_s1 + $0x20] ss:$8 sps:$4 sm:$0xff]   ;;  %v4702_v7 = vld [vmem:[%s6479_s1 + $0x34] ss:$8 sps:$4 sm:$0xff]  }
  0x19   : > { %852 = vmatpush1.bf16.msra.mxu0 %v4695_v1  ;;  %s6518_s12 = smov (!%p382_p10, %s3827_s12), 63  ;;  %v4704_v10 = vld [vmem:[%s6479_s1 + $0x30] ss:$8 sps:$4 sm:$0xff]   ;;  %v4705_v12 = vld [vmem:[%s6479_s1 + $0x44] ss:$8 sps:$4 sm:$0xff]   ;;  %vm5029_vm1 = vmmov 0  }
  0x1a   : > { %853 = vmatprep.subr.bf16.mxu0 %v4696_v3  ;;  %s3828_s30 = sshll.u32 %s6518_s12, 3  ;;  %v4707_v13 = vld [vmem:[%s6479_s1 + $0x40] ss:$8 sps:$4 sm:$0xff]   ;;  %v4708_v14 = vld [vmem:[%s6479_s1 + $0x54] ss:$8 sps:$4 sm:$0xff]   ;;  %s378_s26 = sand.u32 1, %s5017_s18  }
  0x1b   : > { %s5166_s24 = scalar_lea.vmem %s6478_s0, %s3828_s30  ;;  %v4710_v15 = vld [vmem:[%s6479_s1 + $0x50] ss:$8 sps:$4 sm:$0xff]   ;;  %v4713_v18 = vld [vmem:[%s6479_s1 + $0xc4] ss:$8 sps:$4 sm:$0xff]   ;;  %v4711_v20 = vld [vmem:[%s6479_s1 + $0xc0] ss:$8 sps:$4 sm:$0xff]  }
  0x1c   : > { %v391_v8 = vld [vmem:[%s5166_s24 + $0x18] sm:$0xff]  ;;  %v392_v9 = vld [vmem:[%s5166_s24 + $0x20] sm:$0xff]  ;;  %v5189_v17 = vld [vmem:[%s5166_s24 + $0x8] sm:$0xff]  ;;  %s3826_s30 = sshll.u32 %s378_s26, 3  ;;  %s4213_s14 = sshll.u32 %s5112_s21, 7 }
  0x1d   : > { %854 = vmatpush1.bf16.msra.mxu0 %v4698_v4  ;;  %v5173_v11 = vpack.c.bf16 %v392_v9, %v391_v8  ;;  %v388_v16 = vld [vmem:[%s5166_s24] sm:$0xff]  ;;  %v4716_v21 = vld [vmem:[%s6479_s1 + $0xd4] ss:$8 sps:$4 sm:$0xff]   ;;  %v4714_v23 = vld [vmem:[%s6479_s1 + $0xd0] ss:$8 sps:$4 sm:$0xff]   ;;  %s380_s15 = scalar_lea.vmem [#allocation2], %s3826_s30  ;;  %s6436_s12 = scalar_lea.hbm %s6489_s11, %s4213_s14 }
  0x1e   : > { %855 = vmatprep.subr.bf16.mxu0 %v4699_v5  ;;  %v420_v19 = vpack.c.bf16 %v5189_v17, %v388_v16  ;;  %v5203_v22 = vld [vmem:[%s5166_s24 + $0x10] sm:$0xff]  ;;  %v4719_v24 = vld [vmem:[%s6479_s1 + $0xe4] ss:$8 sps:$4 sm:$0xff]   ;;  %v4717_v25 = vld [vmem:[%s6479_s1 + $0xe0] ss:$8 sps:$4 sm:$0xff]   ;;  %s3763_s16 = sshll.u32 %s380_s15, 4  ;;  %s6438_s16 = int_to_ptr.vmem [resolvable:$true] %s3763_s16 }
  0x1f   : > { %v5216_v26 = vpack.c.bf16 %v391_v8, %v5203_v22  ;;  %v4722_v27 = vld [vmem:[%s6479_s1 + $0xf4] ss:$8 sps:$4 sm:$0xff]   ;;  %v5222_v28 = vld [vmem:[%s5166_s24 + $0x28] sm:$0xff]  ;;  %v4720_v29 = vld [vmem:[%s6479_s1 + $0xf0] ss:$8 sps:$4 sm:$0xff]   ;;  %s3750_s25 = scalar_lea.sflag [#allocation3], %s378_s26 }
  0x20   : > { %v4725_v30 = vld [vmem:[%s6479_s1 + $0x104] ss:$8 sps:$4 sm:$0xff]   ;;  %v4723_v31 = vld [vmem:[%s6479_s1 + $0x100] ss:$8 sps:$4 sm:$0xff]   ;;  %v5237_v32 = vpack.c.bf16 %v5222_v28, %v392_v9  ;;  %v4728_v33 = vld [vmem:[%s6479_s1 + $0x114] ss:$8 sps:$4 sm:$0xff]  }
  0x21   : > { %856 = vmatpush1.bf16.msra.mxu0 %v4701_v6  ;;  %v5243_v34 = vld [vmem:[%s5166_s24 + $0x30] sm:$0xff]  ;;  %v5246_v35 = vld [vmem:[%s5166_s24 + $0x38] sm:$0xff]  ;;  %v4731_v37 = vld [vmem:[%s6479_s1 + $0x124] ss:$8 sps:$4 sm:$0xff]   ;;  %s4963_s29 = scalar_lea.vmem %s6438_s16, 128  ;;  %s5030_s21 = smov [#allocation2]  }
  0x22   : > { %857 = vmatprep.subr.bf16.mxu0 %v4702_v7  ;;  %v4726_v36 = vld [vmem:[%s6479_s1 + $0x110] ss:$8 sps:$4 sm:$0xff]   ;;  %v5259_v38 = vpack.c.bf16 %v5246_v35, %v5243_v34  ;;  %v5262_v39 = vld [vmem:[%s5166_s24 + $0x40] sm:$0xff]  ;;  %v5265_v40 = vld [vmem:[%s5166_s24 + $0x48] sm:$0xff]  ;;  %p4964_p11 = scmp.ne.s32.totalorder %s6438_s16, %s4963_s29  ;;  %s4967_s13 = sshll.u32 %s5030_s21, 4  ;;  %s4968_s13 = int_to_ptr.vmem [resolvable:$false] %s4967_s13 }
  0x23   : > { %v5272_v41 = vpack.c.bf16 %v5265_v40, %v5262_v39  ;;  %v5275_v42 = vld [vmem:[%s5166_s24 + $0x50] sm:$0xff]  ;;  %v5278_v43 = vld [vmem:[%s5166_s24 + $0x58] sm:$0xff]  ;;  %v5290_v45 = vld [vmem:[%s5166_s24 + $0x60] sm:$0xff]  ;;  %s4969_s30 = scalar_lea.vmem %s4968_s13, 256  ;;  %p4970_p0 = scmp.lt.s32.totalorder %s6438_s16, %s4968_s13 }
  0x24   : > { %v5285_v44 = vpack.c.bf16 %v5278_v43, %v5275_v42  ;;  %v5293_v46 = vld [vmem:[%s5166_s24 + $0x68] sm:$0xff]  ;;  %v5301_v48 = vld [vmem:[%s5166_s24 + $0x70] sm:$0xff]  ;;  %v5304_v49 = vld [vmem:[%s5166_s24 + $0x78] sm:$0xff]  ;;  %p4965_p12 = pnand %p4964_p11, %p5129_p5  ;;  %p4971_p1 = scmp.lt.s32.totalorder %s4969_s30, %s4963_s29 }
  0x25   : > { %858 = vmatpush1.bf16.msra.mxu0 %v4704_v10  ;;  %v5298_v47 = vpack.c.bf16 %v5293_v46, %v5290_v45  ;;  %v5311_v50 = vpack.c.bf16 %v5304_v49, %v5301_v48  ;;  %v5316_v51 = vld [vmem:[%s5166_s24 + $0x80] sm:$0xff]  ;;  %v5319_v52 = vld [vmem:[%s5166_s24 + $0x88] sm:$0xff]  ;;  %v5327_v54 = vld [vmem:[%s5166_s24 + $0x90] sm:$0xff] }
  0x26   : > { %859 = vmatprep.subr.bf16.mxu0 %v4705_v12  ;;  %v5324_v53 = vpack.c.bf16 %v5319_v52, %v5316_v51  ;;  %v5330_v55 = vld [vmem:[%s5166_s24 + $0x98] sm:$0xff]  ;;  %v5342_v57 = vld [vmem:[%s5166_s24 + $0xa0] sm:$0xff]  ;;  %v5345_v58 = vld [vmem:[%s5166_s24 + $0xa8] sm:$0xff]  ;;  %p4966_p13 = pneg %p4965_p12  ;;  %p4972_p2 = por %p4971_p1, %p4970_p0 }
  0x27   : > { %v5337_v56 = vpack.c.bf16 %v5330_v55, %v5327_v54  ;;  %v5350_v59 = vpack.c.bf16 %v5345_v58, %v5342_v57  ;;  %v5356_v60 = vld [vmem:[%s5166_s24 + $0xb0] sm:$0xff]  ;;  %v5359_v61 = vld [vmem:[%s5166_s24 + $0xb8] sm:$0xff]  ;;  %v5369_v63 = vld [vmem:[%s5166_s24 + $0xc0] sm:$0xff] }
  0x28   : > { %v5363_v62 = vpack.c.bf16 %v5359_v61, %v5356_v60  ;;  %v5372_v0 = vld [vmem:[%s5166_s24 + $0xc8] sm:$0xff]  ;;  %v5382_v3 = vld [vmem:[%s5166_s24 + $0xd0] sm:$0xff]  ;;  %v5385_v4 = vld [vmem:[%s5166_s24 + $0xd8] sm:$0xff]  ;;  %p4973_p3 = pnand %p4972_p2, %p4966_p13 }
  0x29   : > { %860 = vmatpush1.bf16.msra.mxu0 %v4707_v13  ;;  %v5376_v1 = vpack.c.bf16 %v5372_v0, %v5369_v63  ;;  %v5389_v5 = vpack.c.bf16 %v5385_v4, %v5382_v3  ;;  %v4729_v6 = vld [vmem:[%s6479_s1 + $0x120] ss:$8 sps:$4 sm:$0xff]   ;;  %v4734_v7 = vld [vmem:[%s6479_s1 + $0x134] ss:$8 sps:$4 sm:$0xff]   ;;  %v4732_v8 = vld [vmem:[%s6479_s1 + $0x130] ss:$8 sps:$4 sm:$0xff]  }
  0x2a   : > { %861 = vmatprep.subr.bf16.mxu0 %v4708_v14  ;;  %v4737_v9 = vld [vmem:[%s6479_s1 + $0x144] ss:$8 sps:$4 sm:$0xff]   ;;  %v4735_v10 = vld [vmem:[%s6479_s1 + $0x140] ss:$8 sps:$4 sm:$0xff]   ;;  %v4740_v12 = vld [vmem:[%s6479_s1 + $0x154] ss:$8 sps:$4 sm:$0xff]  }
  0x2b   : > { %v4738_v13 = vld [vmem:[%s6479_s1 + $0x150] ss:$8 sps:$4 sm:$0xff]   ;;  %v4743_v14 = vld [vmem:[%s6479_s1 + $0x164] ss:$8 sps:$4 sm:$0xff]   ;;  %v4746_v16 = vld [vmem:[%s6479_s1 + $0x174] ss:$8 sps:$4 sm:$0xff]  }
  0x2d   : > { %862 = vmatpush1.bf16.msra.mxu0 %v4710_v15  ;;  %v4741_v15 = vld [vmem:[%s6479_s1 + $0x160] ss:$8 sps:$4 sm:$0xff]  }
  0x2e   : > { %1101 = vmatprep.subr.bf16.mxu0 %v4713_v18  ;;  %v4744_v18 = vld [vmem:[%s6479_s1 + $0x170] ss:$8 sps:$4 sm:$0xff]  }
  0x30   : > { %3879 = vmatmul.mubr.msk.bf16.vlgmr.msra.gmra.mrb[0].mxu0 %vm533_vm0, %v420_v19  ;;  %v4749_v19 = vld [vmem:[%s6479_s1 + $0x184] ss:$8 sps:$4 sm:$0xff]  }
  0x31   : > { %1102 = vmatpush1.bf16.msra.mxu0 %v4711_v20  ;;  %893 = vmatprep.mubr.bf16.mxu0 %v6490_v2  ;;  %v4762_v20 = vld [vmem:[%s6479_s1 + $0x64] ss:$8 sps:$4 sm:$0xff]  }
  0x32   : > { %1103 = vmatprep.subr.bf16.mxu0 %v4716_v21  ;;  %v4764_v21 = vld [vmem:[%s6479_s1 + $0x60] ss:$8 sps:$4 sm:$0xff]   ;;  %576 = vmatprep.subr.bf16.mxu1 %v4762_v20 }
  0x33   : > { %577 = vmatpush1.bf16.msra.mxu1 %v4764_v21 }
  0x35   : > { %1104 = vmatpush1.bf16.msra.mxu0 %v4714_v23  ;;  %v4765_v23 = vld [vmem:[%s6479_s1 + $0x74] ss:$8 sps:$4 sm:$0xff]  }
  0x36   : > { %1105 = vmatprep.subr.bf16.mxu0 %v4719_v24  ;;  %v4767_v24 = vld [vmem:[%s6479_s1 + $0x70] ss:$8 sps:$4 sm:$0xff]   ;;  %578 = vmatprep.subr.bf16.mxu1 %v4765_v23  ;;  %v4800_v23 = vld [vmem:[%s6481_s3 + $0xd4] ss:$8 sps:$4 sm:$0xff]  }
  0x37   : > { %579 = vmatpush1.bf16.msra.mxu1 %v4767_v24  ;;  %v4798_v24 = vld [vmem:[%s6481_s3 + $0xd0] ss:$8 sps:$4 sm:$0xff]  }
  0x38   : > { %3880 = vmatmul.mubr.msk.bf16.gmra.mrb[4].mxu0 %vm533_vm0, %v5216_v26 }
  0x39   : > { %903 = vmatprep.mubr.bf16.mxu0 %v6490_v2  ;;  %1106 = vmatpush1.bf16.msra.mxu0 %v4717_v25  ;;  %v4768_v25 = vld [vmem:[%s6479_s1 + $0x84] ss:$8 sps:$4 sm:$0xff]  }
  0x3a   : > { %1107 = vmatprep.subr.bf16.mxu0 %v4722_v27  ;;  %580 = vmatprep.subr.bf16.mxu1 %v4768_v25  ;;  %v4774_v27 = vld [vmem:[%s6479_s1 + $0x94] ss:$8 sps:$4 sm:$0xff]  }
  0x3d   : > { %1108 = vmatpush1.bf16.msra.mxu0 %v4720_v29  ;;  %v4776_v29 = vld [vmem:[%s6479_s1 + $0x90] ss:$8 sps:$4 sm:$0xff]  }
  0x3e   : > { %1109 = vmatprep.subr.bf16.mxu0 %v4725_v30  ;;  %v4777_v30 = vld [vmem:[%s6479_s1 + $0xa4] ss:$8 sps:$4 sm:$0xff]  }
  0x40   : > { %3881 = vmatmul.mubr.msk.bf16.gmra.mrb[8].mxu0 %vm533_vm0, %v5237_v32 }
  0x41   : > { %913 = vmatprep.mubr.bf16.mxu0 %v6490_v2  ;;  %1110 = vmatpush1.bf16.msra.mxu0 %v4723_v31  ;;  %v4779_v31 = vld [vmem:[%s6479_s1 + $0xa0] ss:$8 sps:$4 sm:$0xff]  }
  0x42   : > { %1111 = vmatprep.subr.bf16.mxu0 %v4728_v33  ;;  %v4780_v33 = vld [vmem:[%s6479_s1 + $0xb4] ss:$8 sps:$4 sm:$0xff]  }
  0x45   : > { %1112 = vmatpush1.bf16.msra.mxu0 %v4726_v36  ;;  %v4782_v36 = vld [vmem:[%s6479_s1 + $0xb0] ss:$8 sps:$4 sm:$0xff]  }
  0x46   : > { %1407 = vmatprep.subr.bf16.mxu0 %v4731_v37  ;;  %v446_v37 = vpack.c.bf16 %v5203_v22, %v5189_v17  ;;  %v448_v17 = vpack.c.bf16 %v5243_v34, %v5222_v28  ;;  %v4747_v22 = vld [vmem:[%s6479_s1 + $0x180] ss:$8 sps:$4 sm:$0xff]   ;;  %v4750_v28 = vld [vmem:[%s6479_s1 + $0x190] ss:$8 sps:$4 sm:$0xff]   ;;  %v4755_v34 = vld [vmem:[%s6479_s1 + $0x1a4] ss:$8 sps:$4 sm:$0xff]  }
  0x48   : > { %3882 = vmatmul.mubr.msk.bf16.gmra.mrb[12].mxu0 %vm533_vm0, %v5259_v38 }
  0x49   : > { %923 = vmatprep.mubr.bf16.mxu0 %v6490_v2 }
  0x50   : > { %3883 = vmatmul.mubr.msk.bf16.gmra.mrb[16].mxu0 %vm533_vm0, %v5272_v41 }
  0x51   : > { %933 = vmatprep.mubr.bf16.mxu0 %v6490_v2 }
  0x58   : > { %3884 = vmatmul.mubr.msk.bf16.gmra.mrb[20].mxu0 %vm533_vm0, %v5285_v44 }
  0x59   : > { %943 = vmatprep.mubr.bf16.mxu0 %v6490_v2 }
  0x60   : > { %3885 = vmatmul.mubr.msk.bf16.gmra.mrb[24].mxu0 %vm533_vm0, %v5298_v47 }
  0x61   : > { %953 = vmatprep.mubr.bf16.mxu0 %v6490_v2 }
  0x68   : > { %3886 = vmatmul.mubr.msk.bf16.gmra.mrb[28].mxu0 %vm533_vm0, %v5311_v50 }
  0x69   : > { %963 = vmatprep.mubr.bf16.mxu0 %v6490_v2 }
  0x70   : > { %3887 = vmatmul.mubr.msk.bf16.gmra.mrb[32].mxu0 %vm533_vm0, %v5324_v53 }
  0x71   : > { %973 = vmatprep.mubr.bf16.mxu0 %v6490_v2 }
  0x78   : > { %3888 = vmatmul.mubr.msk.bf16.gmra.mrb[36].mxu0 %vm533_vm0, %v5337_v56 }
  0x79   : > { %983 = vmatprep.mubr.bf16.mxu0 %v6490_v2 }
  0x80   : > { %3889 = vmatmul.mubr.msk.bf16.gmra.mrb[40].mxu0 %vm533_vm0, %v5350_v59 }
  0x81   : > { %993 = vmatprep.mubr.bf16.mxu0 %v6490_v2 }
  0x88   : > { %3890 = vmatmul.mubr.msk.bf16.gmra.mrb[44].mxu0 %vm533_vm0, %v5363_v62 }
  0x89   : > { %1003 = vmatprep.mubr.bf16.mxu0 %v6490_v2 }
  0x90   : > { %3891 = vmatmul.mubr.msk.bf16.gmra.mrb[48].mxu0 %vm533_vm0, %v5376_v1 }
  0x91   : > { %1013 = vmatprep.mubr.bf16.mxu0 %v6490_v2 }
  0x98   : > { %3892 = vmatmul.mubr.msk.bf16.gmra.mrb[52].mxu0 %vm533_vm0, %v5389_v5 }
  0x99   : > { %1133 = vmatprep.mubr.bf16.mxu0 %v6490_v2 }
  0xa0   : > { %3917 = vmatmul.mubr.msk.bf16.vlgmr.msra.gmra.mrb[0].mxu0 %vm533_vm0, %v5216_v26  ;;  %v4773_v26 = vld [vmem:[%s6479_s1 + $0x80] ss:$8 sps:$4 sm:$0xff]  }
  0xa1   : > { %1408 = vmatpush1.bf16.msra.mxu0 %v4729_v6  ;;  %1143 = vmatprep.mubr.bf16.mxu0 %v6490_v2  ;;  %v5510_v6 = vld [vmem:[%s5166_s24 + $0xe0] sm:$0xff] }
  0xa2   : > { %1409 = vmatprep.subr.bf16.mxu0 %v4734_v7  ;;  %581 = vmatpush1.bf16.msra.mxu1 %v4773_v26  ;;  %v5513_v7 = vld [vmem:[%s5166_s24 + $0xe8] sm:$0xff] }
  0xa3   : > { %582 = vmatprep.subr.bf16.mxu1 %v4774_v27  ;;  %v4803_v27 = vld [vmem:[%s6481_s3 + $0xe4] ss:$8 sps:$4 sm:$0xff]  }
  0xa5   : > { %1410 = vmatpush1.bf16.msra.mxu0 %v4732_v8  ;;  %v5517_v8 = vpack.c.bf16 %v5513_v7, %v5510_v6 }
  0xa6   : > { %1411 = vmatprep.subr.bf16.mxu0 %v4737_v9  ;;  %583 = vmatpush1.bf16.msra.mxu1 %v4776_v29  ;;  %v4752_v9 = vld [vmem:[%s6479_s1 + $0x194] ss:$8 sps:$4 sm:$0xff]  }
  0xa7   : > { %584 = vmatprep.subr.bf16.mxu1 %v4777_v30  ;;  %v4801_v30 = vld [vmem:[%s6481_s3 + $0xe0] ss:$8 sps:$4 sm:$0xff]  }
  0xa8   : > { %3918 = vmatmul.mubr.msk.bf16.gmra.mrb[4].mxu0 %vm533_vm0, %v5237_v32 }
  0xa9   : > { %1153 = vmatprep.mubr.bf16.mxu0 %v6490_v2  ;;  %1412 = vmatpush1.bf16.msra.mxu0 %v4735_v10  ;;  %v449_v10 = vpack.c.bf16 %v5262_v39, %v5246_v35  ;;  %v4756_v35 = vld [vmem:[%s6479_s1 + $0x1b0] ss:$8 sps:$4 sm:$0xff]   ;;  %v4761_v39 = vld [vmem:[%s6479_s1 + $0x1c4] ss:$8 sps:$4 sm:$0xff]  }
  0xaa   : > { %1413 = vmatprep.subr.bf16.mxu0 %v4740_v12  ;;  %585 = vmatpush1.bf16.msra.mxu1 %v4779_v31  ;;  %v4758_v12 = vld [vmem:[%s6479_s1 + $0x1b4] ss:$8 sps:$4 sm:$0xff]  }
  0xab   : > { %586 = vmatprep.subr.bf16.mxu1 %v4780_v33  ;;  %v4806_v33 = vld [vmem:[%s6481_s3 + $0xf4] ss:$8 sps:$4 sm:$0xff]  }
  0xad   : > { %1414 = vmatpush1.bf16.msra.mxu0 %v4738_v13  ;;  %v450_v13 = vpack.c.bf16 %v5275_v42, %v5265_v40  ;;  %v4770_v40 = vld [vmem:[%s6479_s1 + $0x1d0] ss:$8 sps:$4 sm:$0xff]   ;;  %v451_v42 = vpack.c.bf16 %v5290_v45, %v5278_v43  ;;  %v453_v43 = vpack.c.bf16 %v5316_v51, %v5304_v49  ;;  %v454_v45 = vpack.c.bf16 %v5327_v54, %v5319_v52  ;;  %v4783_v54 = vld [vmem:[%s6481_s3 + $0x80] ss:$8 sps:$4 sm:$0xff]  }
  0xae   : > { %1415 = vmatprep.subr.bf16.mxu0 %v4743_v14  ;;  %587 = vmatpush1.bf16.msra.mxu1 %v4782_v36  ;;  %v4759_v14 = vld [vmem:[%s6479_s1 + $0x1c0] ss:$8 sps:$4 sm:$0xff]   ;;  %v457_v49 = vpack.c.bf16 %v5369_v63, %v5359_v61  ;;  %v458_v51 = vpack.c.bf16 %v5382_v3, %v5372_v0  ;;  %v459_v52 = vpack.c.bf16 %v5510_v6, %v5385_v4  ;;  %v4794_v63 = vld [vmem:[%s6481_s3 + $0xb4] ss:$8 sps:$4 sm:$0xff]   ;;  %v4792_v3 = vld [vmem:[%s6481_s3 + $0xb0] ss:$8 sps:$4 sm:$0xff]  }
  0xaf   : > { %v4789_v61 = vld [vmem:[%s6481_s3 + $0xa0] ss:$8 sps:$4 sm:$0xff]   ;;  %v418_v0 = vld [vmem:[%s5166_s24 + $0xf0] sm:$0xff] }
  0xb0   : > { %3919 = vmatmul.mubr.msk.bf16.gmra.mrb[8].mxu0 %vm533_vm0, %v5259_v38  ;;  %v1330_v4 = vpack.c.bf16 %v418_v0, %v5513_v7  ;;  %v4804_v36 = vld [vmem:[%s6481_s3 + $0xf0] ss:$8 sps:$4 sm:$0xff]  }
  0xb1   : > { %1163 = vmatprep.mubr.bf16.mxu0 %v6490_v2  ;;  %1416 = vmatpush1.bf16.msra.mxu0 %v4741_v15  ;;  %v4772_v15 = vld [vmem:[%s6479_s1 + $0x1d4] ss:$8 sps:$4 sm:$0xff]  }
  0xb2   : > { %1417 = vmatprep.subr.bf16.mxu0 %v4746_v16  ;;  %3853 = vmatmul.mubr.msk.bf16.vlgmr.msra.gmra.mrb[0].mxu1 %vm533_vm0, %v446_v37  ;;  %v452_v16 = vpack.c.bf16 %v5301_v48, %v5293_v46  ;;  %v455_v46 = vpack.c.bf16 %v5342_v57, %v5330_v55  ;;  %v456_v48 = vpack.c.bf16 %v5356_v60, %v5345_v58  ;;  %v4785_v55 = vld [vmem:[%s6481_s3 + $0x84] ss:$8 sps:$4 sm:$0xff]   ;;  %v4788_v57 = vld [vmem:[%s6481_s3 + $0x94] ss:$8 sps:$4 sm:$0xff]   ;;  %v4786_v58 = vld [vmem:[%s6481_s3 + $0x90] ss:$8 sps:$4 sm:$0xff]  }
  0xb3   : > { %618 = vmatprep.mubr.bf16.mxu1 %v6490_v2  ;;  %2170 = vmatprep.subr.bf16.mxu1 %v4785_v55  ;;  %v4791_v60 = vld [vmem:[%s6481_s3 + $0xa4] ss:$8 sps:$4 sm:$0xff]  }
  0xb4   : > { %2171 = vmatpush1.bf16.msra.mxu1 %v4783_v54 }
  0xb5   : > { %1418 = vmatpush1.bf16.msra.mxu0 %v4744_v18  ;;  %2172 = vmatprep.subr.bf16.mxu1 %v4788_v57 }
  0xb6   : > { %1713 = vmatprep.subr.bf16.mxu0 %v4749_v19 }
  0xb8   : > { %3920 = vmatmul.mubr.msk.bf16.gmra.mrb[12].mxu0 %vm533_vm0, %v5272_v41  ;;  %2173 = vmatpush1.bf16.msra.mxu1 %v4786_v58 }
  0xb9   : > { %1173 = vmatprep.mubr.bf16.mxu0 %v6490_v2  ;;  %2174 = vmatprep.subr.bf16.mxu1 %v4791_v60 }
  0xba   : > { %3854 = vmatmul.mubr.msk.bf16.gmra.mrb[4].mxu1 %vm533_vm0, %v5173_v11 }
  0xbb   : > { %628 = vmatprep.mubr.bf16.mxu1 %v6490_v2 }
  0xbc   : > { %2175 = vmatpush1.bf16.msra.mxu1 %v4789_v61 }
  0xbd   : > { %2176 = vmatprep.subr.bf16.mxu1 %v4794_v63 }
  0xc0   : > { %3921 = vmatmul.mubr.msk.bf16.gmra.mrb[16].mxu0 %vm533_vm0, %v5285_v44  ;;  %2177 = vmatpush1.bf16.msra.mxu1 %v4792_v3 }
  0xc1   : > { %1183 = vmatprep.mubr.bf16.mxu0 %v6490_v2 }
  0xc2   : > { %3855 = vmatmul.mubr.msk.bf16.gmra.mrb[8].mxu1 %vm533_vm0, %v448_v17 }
  0xc3   : > { %638 = vmatprep.mubr.bf16.mxu1 %v6490_v2 }
  0xc8   : > { %3922 = vmatmul.mubr.msk.bf16.gmra.mrb[20].mxu0 %vm533_vm0, %v5298_v47 }
  0xc9   : > { %1193 = vmatprep.mubr.bf16.mxu0 %v6490_v2 }
  0xca   : > { %3856 = vmatmul.mubr.msk.bf16.gmra.mrb[12].mxu1 %vm533_vm0, %v449_v10 }
  0xcb   : > { %648 = vmatprep.mubr.bf16.mxu1 %v6490_v2 }
  0xd0   : > { %3923 = vmatmul.mubr.msk.bf16.gmra.mrb[24].mxu0 %vm533_vm0, %v5311_v50 }
  0xd1   : > { %1203 = vmatprep.mubr.bf16.mxu0 %v6490_v2 }
  0xd2   : > { %3857 = vmatmul.mubr.msk.bf16.gmra.mrb[16].mxu1 %vm533_vm0, %v450_v13 }
  0xd3   : > { %658 = vmatprep.mubr.bf16.mxu1 %v6490_v2 }
  0xd8   : > { %3924 = vmatmul.mubr.msk.bf16.gmra.mrb[28].mxu0 %vm533_vm0, %v5324_v53 }
  0xd9   : > { %1213 = vmatprep.mubr.bf16.mxu0 %v6490_v2 }
  0xda   : > { %3858 = vmatmul.mubr.msk.bf16.gmra.mrb[20].mxu1 %vm533_vm0, %v451_v42 }
  0xdb   : > { %668 = vmatprep.mubr.bf16.mxu1 %v6490_v2 }
  0xe0   : > { %3925 = vmatmul.mubr.msk.bf16.gmra.mrb[32].mxu0 %vm533_vm0, %v5337_v56 }
  0xe1   : > { %1223 = vmatprep.mubr.bf16.mxu0 %v6490_v2 }
  0xe2   : > { %3859 = vmatmul.mubr.msk.bf16.gmra.mrb[24].mxu1 %vm533_vm0, %v452_v16 }
  0xe3   : > { %678 = vmatprep.mubr.bf16.mxu1 %v6490_v2 }
  0xe8   : > { %3926 = vmatmul.mubr.msk.bf16.gmra.mrb[36].mxu0 %vm533_vm0, %v5350_v59 }
  0xe9   : > { %1233 = vmatprep.mubr.bf16.mxu0 %v6490_v2 }
  0xea   : > { %3860 = vmatmul.mubr.msk.bf16.gmra.mrb[28].mxu1 %vm533_vm0, %v453_v43 }
  0xeb   : > { %688 = vmatprep.mubr.bf16.mxu1 %v6490_v2 }
  0xf0   : > { %3927 = vmatmul.mubr.msk.bf16.gmra.mrb[40].mxu0 %vm533_vm0, %v5363_v62 }
  0xf1   : > { %1243 = vmatprep.mubr.bf16.mxu0 %v6490_v2 }
  0xf2   : > { %3861 = vmatmul.mubr.msk.bf16.gmra.mrb[32].mxu1 %vm533_vm0, %v454_v45 }
  0xf3   : > { %698 = vmatprep.mubr.bf16.mxu1 %v6490_v2 }
  0xf8   : > { %3928 = vmatmul.mubr.msk.bf16.gmra.mrb[44].mxu0 %vm533_vm0, %v5376_v1 }
  0xf9   : > { %1253 = vmatprep.mubr.bf16.mxu0 %v6490_v2 }
  0xfa   : > { %3862 = vmatmul.mubr.msk.bf16.gmra.mrb[36].mxu1 %vm533_vm0, %v455_v46 }
  0xfb   : > { %708 = vmatprep.mubr.bf16.mxu1 %v6490_v2 }
 0x100   : > { %3929 = vmatmul.mubr.msk.bf16.gmra.mrb[48].mxu0 %vm533_vm0, %v5389_v5 }
 0x101   : > { %1263 = vmatprep.mubr.bf16.mxu0 %v6490_v2 }
 0x102   : > { %3863 = vmatmul.mubr.msk.bf16.gmra.mrb[40].mxu1 %vm533_vm0, %v456_v48 }
 0x103   : > { %718 = vmatprep.mubr.bf16.mxu1 %v6490_v2 }
 0x108   : > { %3930 = vmatmul.mubr.msk.bf16.gmra.mrb[52].mxu0 %vm533_vm0, %v5517_v8 }
 0x109   : > { %1439 = vmatprep.mubr.bf16.mxu0 %v6490_v2 }
 0x10a   : > { %3864 = vmatmul.mubr.msk.bf16.gmra.mrb[44].mxu1 %vm533_vm0, %v457_v49 }
 0x10b   : > { %728 = vmatprep.mubr.bf16.mxu1 %v6490_v2 }
 0x110   : > { %3955 = vmatmul.mubr.msk.bf16.vlgmr.msra.gmra.mrb[0].mxu0 %vm533_vm0, %v5173_v11  ;;  %v4753_v11 = vld [vmem:[%s6479_s1 + $0x1a0] ss:$8 sps:$4 sm:$0xff]  }
 0x111   : > { %1714 = vmatpush1.bf16.msra.mxu0 %v4747_v22  ;;  %1449 = vmatprep.mubr.bf16.mxu0 %v6490_v2 }
 0x112   : > { %1715 = vmatprep.subr.bf16.mxu0 %v4752_v9  ;;  %3865 = vmatmul.mubr.msk.bf16.gmra.mrb[48].mxu1 %vm533_vm0, %v458_v51 }
 0x113   : > { %738 = vmatprep.mubr.bf16.mxu1 %v6490_v2 }
 0x115   : > { %1716 = vmatpush1.bf16.msra.mxu0 %v4750_v28 }
 0x116   : > { %1717 = vmatprep.subr.bf16.mxu0 %v4755_v34 }
 0x118   : > { %3956 = vmatmul.mubr.msk.bf16.gmra.mrb[4].mxu0 %vm533_vm0, %v448_v17 }
 0x119   : > { %1459 = vmatprep.mubr.bf16.mxu0 %v6490_v2  ;;  %1718 = vmatpush1.bf16.msra.mxu0 %v4753_v11 }
 0x11a   : > { %1719 = vmatprep.subr.bf16.mxu0 %v4758_v12  ;;  %3866 = vmatmul.mubr.msk.bf16.gmra.mrb[52].mxu1 %vm533_vm0, %v459_v52 }
 0x11b   : > { %2202 = vmatprep.mubr.bf16.mxu1 %v6490_v2 }
 0x11d   : > { %1720 = vmatpush1.bf16.msra.mxu0 %v4756_v35 }
 0x11e   : > { %1721 = vmatprep.subr.bf16.mxu0 %v4761_v39 }
 0x120   : > { %3957 = vmatmul.mubr.msk.bf16.gmra.mrb[8].mxu0 %vm533_vm0, %v449_v10 }
 0x121   : > { %1469 = vmatprep.mubr.bf16.mxu0 %v6490_v2  ;;  %1722 = vmatpush1.bf16.msra.mxu0 %v4759_v14 }
 0x122   : > { %1723 = vmatprep.subr.bf16.mxu0 %v4772_v15 }
 0x125   : > { %1724 = vmatpush1.bf16.msra.mxu0 %v4770_v40 }
 0x128   : > { %3958 = vmatmul.mubr.msk.bf16.gmra.mrb[12].mxu0 %vm533_vm0, %v450_v13 }
 0x129   : > { %1479 = vmatprep.mubr.bf16.mxu0 %v6490_v2 }
 0x130   : > { %3959 = vmatmul.mubr.msk.bf16.gmra.mrb[16].mxu0 %vm533_vm0, %v451_v42 }
 0x131   : > { %1489 = vmatprep.mubr.bf16.mxu0 %v6490_v2 }
 0x138   : > { %3960 = vmatmul.mubr.msk.bf16.gmra.mrb[20].mxu0 %vm533_vm0, %v452_v16 }
 0x139   : > { %1499 = vmatprep.mubr.bf16.mxu0 %v6490_v2 }
 0x140   : > { %3961 = vmatmul.mubr.msk.bf16.gmra.mrb[24].mxu0 %vm533_vm0, %v453_v43  ;;  %v4809_v43 = vld [vmem:[%s6481_s3 + $0x4] ss:$8 sps:$4 sm:$0xff]  }
 0x141   : > { %1509 = vmatprep.mubr.bf16.mxu0 %v6490_v2 }
 0x148   : > { %3962 = vmatmul.mubr.msk.bf16.gmra.mrb[28].mxu0 %vm533_vm0, %v454_v45 }
 0x149   : > { %1519 = vmatprep.mubr.bf16.mxu0 %v6490_v2 }
 0x150   : > { %3963 = vmatmul.mubr.msk.bf16.gmra.mrb[32].mxu0 %vm533_vm0, %v455_v46 }
 0x151   : > { %1529 = vmatprep.mubr.bf16.mxu0 %v6490_v2 }
 0x158   : > { %3964 = vmatmul.mubr.msk.bf16.gmra.mrb[36].mxu0 %vm533_vm0, %v456_v48 }
 0x159   : > { %1539 = vmatprep.mubr.bf16.mxu0 %v6490_v2 }
 0x160   : > { %3965 = vmatmul.mubr.msk.bf16.gmra.mrb[40].mxu0 %vm533_vm0, %v457_v49 }
 0x161   : > { %1549 = vmatprep.mubr.bf16.mxu0 %v6490_v2 }
 0x168   : > { %3966 = vmatmul.mubr.msk.bf16.gmra.mrb[44].mxu0 %vm533_vm0, %v458_v51 }
 0x169   : > { %1559 = vmatprep.mubr.bf16.mxu0 %v6490_v2 }
 0x170   : > { %3967 = vmatmul.mubr.msk.bf16.gmra.mrb[48].mxu0 %vm533_vm0, %v459_v52 }
 0x171   : > { %1569 = vmatprep.mubr.bf16.mxu0 %v6490_v2 }
 0x178   : > { %3968 = vmatmul.mubr.msk.bf16.gmra.mrb[52].mxu0 %vm533_vm0, %v1330_v4 }
 0x179   : > { %1745 = vmatprep.mubr.bf16.mxu0 %v6490_v2 }
 0x180   : > { %3993 = vmatmul.mubr.msk.bf16.vlgmr.msra.gmra.mrb[0].mxu0 %vm533_vm0, %v5237_v32 }
 0x181   : > { %1755 = vmatprep.mubr.bf16.mxu0 %v6490_v2 }
 0x185   : > { %v5693_v32 = vpop.f32.mrb[0].mxu1 }
 0x188   : > { %3994 = vmatmul.mubr.msk.bf16.gmra.mrb[4].mxu0 %vm533_vm0, %v5259_v38  ;;  %v5696_v38 = vpop.f32.mrb[1].mxu1 }
 0x189   : > { %1765 = vmatprep.mubr.bf16.mxu0 %v6490_v2 }
 0x190   : > { %3995 = vmatmul.mubr.msk.bf16.gmra.mrb[8].mxu0 %vm533_vm0, %v5272_v41  ;;  %v5698_v41 = vpop.f32.mrb[2].mxu1 }
 0x191   : > { %1775 = vmatprep.mubr.bf16.mxu0 %v6490_v2 }
 0x198   : > { %3996 = vmatmul.mubr.msk.bf16.gmra.mrb[12].mxu0 %vm533_vm0, %v5285_v44  ;;  %v5700_v44 = vpop.f32.mrb[3].mxu1 }
 0x199   : > { %1785 = vmatprep.mubr.bf16.mxu0 %v6490_v2 }
 0x1a0   : > { %3997 = vmatmul.mubr.msk.bf16.gmra.mrb[16].mxu0 %vm533_vm0, %v5298_v47  ;;  %v5704_v47 = vpop.f32.mrb[4].mxu1 }
 0x1a1   : > { %1795 = vmatprep.mubr.bf16.mxu0 %v6490_v2 }
 0x1a8   : > { %3998 = vmatmul.mubr.msk.bf16.gmra.mrb[20].mxu0 %vm533_vm0, %v5311_v50  ;;  %v5707_v50 = vpop.f32.mrb[5].mxu1 }
 0x1a9   : > { %1805 = vmatprep.mubr.bf16.mxu0 %v6490_v2 }
 0x1b0   : > { %3999 = vmatmul.mubr.msk.bf16.gmra.mrb[24].mxu0 %vm533_vm0, %v5324_v53  ;;  %v5709_v53 = vpop.f32.mrb[6].mxu1 }
 0x1b1   : > { %1815 = vmatprep.mubr.bf16.mxu0 %v6490_v2 }
 0x1b8   : > { %4000 = vmatmul.mubr.msk.bf16.gmra.mrb[28].mxu0 %vm533_vm0, %v5337_v56  ;;  %v5711_v56 = vpop.f32.mrb[7].mxu1 }
 0x1b9   : > { %1825 = vmatprep.mubr.bf16.mxu0 %v6490_v2 }
 0x1c0   : > { %4001 = vmatmul.mubr.msk.bf16.gmra.mrb[32].mxu0 %vm533_vm0, %v5350_v59  ;;  %v4795_v59 = vld [vmem:[%s6481_s3 + $0xc0] ss:$8 sps:$4 sm:$0xff]  }
 0x1c1   : > { %1835 = vmatprep.mubr.bf16.mxu0 %v6490_v2 }
 0x1c8   : > { %4002 = vmatmul.mubr.msk.bf16.gmra.mrb[36].mxu0 %vm533_vm0, %v5363_v62  ;;  %v4797_v62 = vld [vmem:[%s6481_s3 + $0xc4] ss:$8 sps:$4 sm:$0xff]  }
 0x1c9   : > { %1845 = vmatprep.mubr.bf16.mxu0 %v6490_v2  ;;  %2178 = vmatprep.subr.bf16.mxu1 %v4797_v62 }
 0x1ca   : > { %2179 = vmatpush1.bf16.msra.mxu1 %v4795_v59 }
 0x1cb   : > { %2180 = vmatprep.subr.bf16.mxu1 %v4800_v23 }
 0x1ce   : > { %2181 = vmatpush1.bf16.msra.mxu1 %v4798_v24 }
 0x1cf   : > { %2182 = vmatprep.subr.bf16.mxu1 %v4803_v27 }
 0x1d0   : > { %4003 = vmatmul.mubr.msk.bf16.gmra.mrb[40].mxu0 %vm533_vm0, %v5376_v1  ;;  %v5721_v1 = vpop.f32.mrb[8].mxu1 }
 0x1d1   : > { %1855 = vmatprep.mubr.bf16.mxu0 %v6490_v2  ;;  %v5725_v18 = vpop.f32.mrb[9].mxu1 }
 0x1d2   : > { %v5727_v19 = vpop.f32.mrb[10].mxu1  ;;  %2183 = vmatpush1.bf16.msra.mxu1 %v4801_v30 }
 0x1d3   : > { %v5729_v20 = vpop.f32.mrb[11].mxu1  ;;  %2184 = vmatprep.subr.bf16.mxu1 %v4806_v33 }
 0x1d4   : > { %v5738_v25 = vpop.f32.mrb[12].mxu1 }
 0x1d5   : > { %v5740_v26 = vpop.f32.mrb[13].mxu1 }
 0x1d6   : > { %v5745_v29 = vpop.f32.mrb[14].mxu1  ;;  %2185 = vmatpush1.bf16.msra.mxu1 %v4804_v36  ;;  %v5846_v36 = vld [vmem:[%s6480_s2] ss:$0 sm:$0xff] }
 0x1d7   : > { %v5750_v31 = vpop.f32.mrb[15].mxu1  ;;  %2333 = vmatprep.subr.bf16.mxu1 %v4809_v43 }
 0x1d8   : > { %4004 = vmatmul.mubr.msk.bf16.gmra.mrb[44].mxu0 %vm533_vm0, %v5389_v5  ;;  %v419_v5 = vld [vmem:[%s5166_s24 + $0xf8] sm:$0xff]  ;;  %v5758_v37 = vpop.f32.mrb[16].mxu1 }
 0x1d9   : > { %1865 = vmatprep.mubr.bf16.mxu0 %v6490_v2  ;;  %v1636_v21 = vpack.c.bf16 %v419_v5, %v418_v0  ;;  %v5760_v6 = vpop.f32.mrb[17].mxu1 }
 0x1da   : > { %v5762_v7 = vpop.f32.mrb[18].mxu1 }
 0x1e0   : > { %4005 = vmatmul.mubr.msk.bf16.gmra.mrb[48].mxu0 %vm533_vm0, %v5517_v8  ;;  %v5764_v8 = vpop.f32.mrb[19].mxu1 }
 0x1e1   : > { %1875 = vmatprep.mubr.bf16.mxu0 %v6490_v2  ;;  %v5766_v17 = vpop.f32.mrb[20].mxu1 }
 0x1e2   : > { %v5768_v22 = vpop.f32.mrb[21].mxu1 }
 0x1e3   : > { %v5770_v9 = vpop.f32.mrb[22].mxu1 }
 0x1e4   : > { %v5772_v28 = vpop.f32.mrb[23].mxu1 }
 0x1e5   : > { %v5774_v34 = vpop.f32.mrb[24].mxu1 }
 0x1e6   : > { %v5776_v10 = vpop.f32.mrb[25].mxu1 }
 0x1e7   : > { %v5778_v11 = vpop.f32.mrb[26].mxu1 }
 0x1e8   : > { %4006 = vmatmul.mubr.msk.bf16.gmra.mrb[52].mxu0 %vm533_vm0, %v1636_v21  ;;  %v5780_v12 = vpop.f32.mrb[27].mxu1 }
 0x1e9   : > { %v5782_v35 = vpop.f32.mrb[28].mxu1 }
 0x1ea   : > { %v5784_v39 = vpop.f32.mrb[29].mxu1 }
 0x1eb   : > { %v5786_v13 = vpop.f32.mrb[30].mxu1 }
 0x1ec   : > { %v5788_v14 = vpop.f32.mrb[31].mxu1 }
 0x1ed   : > { %v5790_v15 = vpop.f32.mrb[32].mxu1 }
 0x1ee   : > { %v5792_v40 = vpop.f32.mrb[33].mxu1 }
 0x1ef   : > { %v5794_v42 = vpop.f32.mrb[34].mxu1 }
 0x1f0   : > { %v5796_v16 = vpop.f32.mrb[35].mxu1 }
 0x1f1   : > { %v5801_v45 = vpop.f32.mrb[36].mxu1 }
 0x1f2   : > { %v5803_v46 = vpop.f32.mrb[37].mxu1 }
 0x1f3   : > { %v5805_v48 = vpop.f32.mrb[38].mxu1 }
 0x1f4   : > { %v5807_v49 = vpop.f32.mrb[39].mxu1 }
 0x1f5   : > { %v5809_v51 = vpop.f32.mrb[40].mxu1 }
 0x1f6   : > { %v5811_v52 = vpop.f32.mrb[41].mxu1 }
 0x1f7   : > { %v5813_v54 = vpop.f32.mrb[42].mxu1 }
 0x1f8   : > { %v5815_v55 = vpop.f32.mrb[43].mxu1 }
 0x1f9   : > { %v5817_v57 = vpop.f32.mrb[44].mxu1 }
 0x1fa   : > { %v5819_v58 = vpop.f32.mrb[45].mxu1 }
 0x1fb   : > { %v5821_v60 = vpop.f32.mrb[46].mxu1 }
 0x1fc   : > { %v5823_v61 = vpop.f32.mrb[47].mxu1 }
 0x1fd   : > { %v5825_v63 = vpop.f32.mrb[48].mxu1 }
 0x1fe   : > { %6495 = vst [vmem:[#allocation6_spill] sm:$0xff] %v5825_v63  ;;  %v5827_v0 = vpop.f32.mrb[49].mxu1 }
 0x1ff   : > { %6496 = vst [vmem:[#allocation7_spill] sm:$0xff] %v5827_v0  ;;  %v5829_v3 = vpop.f32.mrb[50].mxu1 }
 0x200   : > { %6497 = vst [vmem:[#allocation8_spill] sm:$0xff] %v5829_v3  ;;  %v5831_v4 = vpop.f32.mrb[51].mxu1 }
 0x201   : > { %6498 = vst [vmem:[#allocation9_spill] sm:$0xff] %v5831_v4  ;;  %v5833_v59 = vpop.f32.mrb[52].mxu1 }
 0x202   : > { %6499 = vst [vmem:[#allocation10_spill] sm:$0xff] %v5833_v59  ;;  %v5835_v62 = vpop.f32.mrb[53].mxu1 }
 0x203   : > { %6500 = vst [vmem:[#allocation11_spill] sm:$0xff] %v5835_v62  ;;  %v5837_v5 = vpop.f32.mrb[54].mxu1 }
 0x204   : > { %6501 = vst [vmem:[#allocation12_spill] sm:$0xff] %v5837_v5  ;;  %v5839_v21 = vpop.f32.mrb[55].mxu1 }
 0x205   : > { %6502 = vst [vmem:[#allocation13_spill] sm:$0xff] %v5839_v21 }
 0x253   : > { %v1747_v23 = vpop.f32.mrb[0].mxu0 }
 0x254   : > { %v4347_v24 = vadd.f32 %v1747_v23, %v5693_v32  ;;  %v1749_v27 = vpop.f32.mrb[1].mxu0 }
 0x255   : > { %v4348_v30 = vadd.f32 %v1749_v27, %v5696_v38  ;;  %v1751_v33 = vpop.f32.mrb[2].mxu0 }
 0x256   : > { %v4349_v43 = vadd.f32 %v1751_v33, %v5698_v41  ;;  %v1753_v2 = vpop.f32.mrb[3].mxu0 }
 0x257   : > { %v1942_v62 = vmax.f32 %v4347_v24, %v4348_v30  ;;  %v4350_v5 = vadd.f32 %v1753_v2, %v5700_v44 }
 0x259   : > { %v1977_v21 = vadd.f32 %v5846_v36, %v1942_v62  ;;  %v1943_v59 = vmax.f32 %v4349_v43, %v4350_v5 }
 0x25b   : > { %v1978_v32 = vadd.f32 %v5846_v36, %v1943_v59  ;;  %v1757_v23 = vpop.f32.mrb[4].mxu0  ;;  %v2005_v4 = vmax.f32 %v1977_v21, 0.0 }
 0x25c   : > { %v4351_v38 = vadd.f32 %v1757_v23, %v5704_v47  ;;  %v1759_v27 = vpop.f32.mrb[5].mxu0 }
 0x25d   : > { %v2006_v3 = vmax.f32 %v1978_v32, 0.0  ;;  %v4352_v0 = vadd.f32 %v1759_v27, %v5707_v50  ;;  %v1761_v63 = vpop.f32.mrb[6].mxu0 }
 0x25e   : > { %v4353_v41 = vadd.f32 %v1761_v63, %v5709_v53  ;;  %v1763_v33 = vpop.f32.mrb[7].mxu0 }
 0x25f   : > { %v5855_v24 = vmax.f32 %v2005_v4, %v2006_v3  ;;  %v1944_v2 = vmax.f32 %v4351_v38, %v4352_v0  ;;  %v4354_v44 = vadd.f32 %v1763_v33, %v5711_v56 }
 0x261   : > { %v1979_v62 = vadd.f32 %v5846_v36, %v1944_v2  ;;  %v1945_v59 = vmax.f32 %v4353_v41, %v4354_v44 }
 0x263   : > { %v1980_v5 = vadd.f32 %v5846_v36, %v1945_v59  ;;  %v1767_v47 = vpop.f32.mrb[8].mxu0  ;;  %v2007_v43 = vmax.f32 %v1979_v62, 0.0 }
 0x264   : > { %v4355_v21 = vadd.f32 %v1767_v47, %v5721_v1  ;;  %v1769_v30 = vpop.f32.mrb[9].mxu0 }
 0x265   : > { %v2008_v50 = vmax.f32 %v1980_v5, 0.0  ;;  %v4356_v32 = vadd.f32 %v1769_v30, %v5725_v18  ;;  %v1771_v53 = vpop.f32.mrb[10].mxu0  ;;  %v4807_v30 = vld [vmem:[%s6481_s3] ss:$8 sps:$4 sm:$0xff]  }
 0x266   : > { %v4357_v63 = vadd.f32 %v1771_v53, %v5727_v19  ;;  %v1773_v3 = vpop.f32.mrb[11].mxu0 }
 0x267   : > { %v5863_v0 = vmax.f32 %v2007_v43, %v2008_v50  ;;  %v1946_v56 = vmax.f32 %v4355_v21, %v4356_v32  ;;  %v4358_v4 = vadd.f32 %v1773_v3, %v5729_v20  ;;  %v4810_v3 = vld [vmem:[%s6481_s3 + $0x10] ss:$8 sps:$4 sm:$0xff]  }
 0x269   : > { %v2047_v23 = vpack.c.bf16 %v5863_v0, %v5855_v24  ;;  %v1981_v38 = vadd.f32 %v5846_v36, %v1946_v56  ;;  %v1947_v1 = vmax.f32 %v4357_v63, %v4358_v4  ;;  %v6503_v63 = vmov 0   ;;  %v4839_v24 = vld [vmem:[%s6481_s3 + $0x124] ss:$8 sps:$4 sm:$0xff]  }
 0x26b   : > { %v1982_v27 = vadd.f32 %v5846_v36, %v1947_v1  ;;  %v1777_v41 = vpop.f32.mrb[12].mxu0  ;;  %v2009_v2 = vmax.f32 %v1981_v38, 0.0 }
 0x26c   : > { %v4359_v18 = vadd.f32 %v1777_v41, %v5738_v25  ;;  %v1779_v33 = vpop.f32.mrb[13].mxu0 }
 0x26d   : > { %v2010_v19 = vmax.f32 %v1982_v27, 0.0  ;;  %v4360_v44 = vadd.f32 %v1779_v33, %v5740_v26  ;;  %v1781_v62 = vpop.f32.mrb[14].mxu0  ;;  %v4812_v26 = vld [vmem:[%s6481_s3 + $0x14] ss:$8 sps:$4 sm:$0xff]   ;;  %v4815_v27 = vld [vmem:[%s6481_s3 + $0x24] ss:$8 sps:$4 sm:$0xff]  }
 0x26e   : > { %v4361_v59 = vadd.f32 %v1781_v62, %v5745_v29  ;;  %v1783_v20 = vpop.f32.mrb[15].mxu0  ;;  %v4818_v62 = vld [vmem:[%s6481_s3 + $0x34] ss:$8 sps:$4 sm:$0xff]  }
 0x26f   : > { %v2035_v5 = vmax.f32 %v2009_v2, %v2010_v19  ;;  %v1948_v47 = vmax.f32 %v4359_v18, %v4360_v44  ;;  %v4362_v21 = vadd.f32 %v1783_v20, %v5750_v31  ;;  %v4813_v19 = vld [vmem:[%s6481_s3 + $0x20] ss:$8 sps:$4 sm:$0xff]  }
 0x271   : > { %v2068_v43 = vpack.c.bf16 %v2035_v5, %v5863_v0  ;;  %v1983_v25 = vadd.f32 %v5846_v36, %v1948_v47  ;;  %v1949_v50 = vmax.f32 %v4361_v59, %v4362_v21  ;;  %v4816_v21 = vld [vmem:[%s6481_s3 + $0x30] ss:$8 sps:$4 sm:$0xff]   ;;  %v6510_v0 = vld [vmem:[#allocation12_spill] sm:$0xff] }
 0x273   : > { %v1984_v29 = vadd.f32 %v5846_v36, %v1949_v50  ;;  %v1787_v32 = vpop.f32.mrb[16].mxu0  ;;  %2203 = vmatmul.mubr.bf16.vlgmr.msra.gmra.mrb[56].mxu1 %v2068_v43  ;;  %v2011_v56 = vmax.f32 %v1983_v25, 0.0 }
 0x274   : > { %v4363_v53 = vadd.f32 %v1787_v32, %v5758_v37  ;;  %v1789_v31 = vpop.f32.mrb[17].mxu0  ;;  %2212 = vmatprep.mubr.bf16.mxu1 %v6503_v63  ;;  %2334 = vmatpush1.bf16.msra.mxu1 %v4807_v30 }
 0x275   : > { %v2012_v4 = vmax.f32 %v1984_v29, 0.0  ;;  %v4364_v38 = vadd.f32 %v1789_v31, %v5760_v6  ;;  %v1791_v1 = vpop.f32.mrb[18].mxu0  ;;  %2335 = vmatprep.subr.bf16.mxu1 %v4812_v26  ;;  %v4819_v31 = vld [vmem:[%s6481_s3 + $0x40] ss:$8 sps:$4 sm:$0xff]  }
 0x276   : > { %v4365_v37 = vadd.f32 %v1791_v1, %v5762_v7  ;;  %v1793_v41 = vpop.f32.mrb[19].mxu0 }
 0x277   : > { %v1950_v18 = vmax.f32 %v4363_v53, %v4364_v38  ;;  %v4366_v33 = vadd.f32 %v1793_v41, %v5764_v8  ;;  %v2036_v2 = vmax.f32 %v2011_v56, %v2012_v4 }
 0x278   : > { %2336 = vmatpush1.bf16.msra.mxu1 %v4810_v3 }
 0x279   : > { %v1985_v6 = vadd.f32 %v5846_v36, %v1950_v18  ;;  %v1951_v44 = vmax.f32 %v4365_v37, %v4366_v33  ;;  %2337 = vmatprep.subr.bf16.mxu1 %v4815_v27  ;;  %v5901_v59 = vpack.c.bf16 %v2036_v2, %v2035_v5  ;;  %v4821_v5 = vld [vmem:[%s6481_s3 + $0x44] ss:$8 sps:$4 sm:$0xff]   ;;  %v4822_v27 = vld [vmem:[%s6481_s3 + $0x50] ss:$8 sps:$4 sm:$0xff]  }
 0x27b   : > { %v1986_v7 = vadd.f32 %v5846_v36, %v1951_v44  ;;  %v1797_v20 = vpop.f32.mrb[20].mxu0  ;;  %v2013_v30 = vmax.f32 %v1985_v6, 0.0 }
 0x27c   : > { %v4367_v8 = vadd.f32 %v1797_v20, %v5766_v17  ;;  %v1799_v47 = vpop.f32.mrb[21].mxu0  ;;  %2338 = vmatpush1.bf16.msra.mxu1 %v4813_v19 }
 0x27d   : > { %v2014_v43 = vmax.f32 %v1986_v7, 0.0  ;;  %v4368_v25 = vadd.f32 %v1799_v47, %v5768_v22  ;;  %v1801_v50 = vpop.f32.mrb[22].mxu0  ;;  %2339 = vmatprep.subr.bf16.mxu1 %v4818_v62  ;;  %v4825_v7 = vld [vmem:[%s6481_s3 + $0x60] ss:$8 sps:$4 sm:$0xff]  }
 0x27e   : > { %v4369_v26 = vadd.f32 %v1801_v50, %v5770_v9  ;;  %v1803_v29 = vpop.f32.mrb[23].mxu0  ;;  %v4824_v9 = vld [vmem:[%s6481_s3 + $0x54] ss:$8 sps:$4 sm:$0xff]  }
 0x27f   : > { %v1952_v17 = vmax.f32 %v4367_v8, %v4368_v25  ;;  %v4370_v32 = vadd.f32 %v1803_v29, %v5772_v28  ;;  %v2037_v53 = vmax.f32 %v2013_v30, %v2014_v43  ;;  %v4830_v8 = vld [vmem:[%s6481_s3 + $0x74] ss:$8 sps:$4 sm:$0xff]   ;;  %v4828_v43 = vld [vmem:[%s6481_s3 + $0x70] ss:$8 sps:$4 sm:$0xff]   ;;  %v4833_v29 = vld [vmem:[%s6481_s3 + $0x104] ss:$8 sps:$4 sm:$0xff]  }
 0x280   : > { %2340 = vmatpush1.bf16.msra.mxu1 %v4816_v21 }
 0x281   : > { %v1987_v22 = vadd.f32 %v5846_v36, %v1952_v17  ;;  %v1953_v3 = vmax.f32 %v4369_v26, %v4370_v32  ;;  %v5918_v56 = vpack.c.bf16 %v2037_v53, %v2036_v2  ;;  %2341 = vmatprep.subr.bf16.mxu1 %v4821_v5  ;;  %v4827_v2 = vld [vmem:[%s6481_s3 + $0x64] ss:$8 sps:$4 sm:$0xff]  }
 0x283   : > { %v1988_v4 = vadd.f32 %v5846_v36, %v1953_v3  ;;  %v1807_v38 = vpop.f32.mrb[24].mxu0  ;;  %2213 = vmatmul.mubr.bf16.gmra.mrb[60].mxu1 %v5918_v56  ;;  %v2015_v37 = vmax.f32 %v1987_v22, 0.0 }
 0x284   : > { %v4371_v28 = vadd.f32 %v1807_v38, %v5774_v34  ;;  %v1809_v1 = vpop.f32.mrb[25].mxu0  ;;  %2222 = vmatprep.mubr.bf16.mxu1 %v6503_v63  ;;  %2342 = vmatpush1.bf16.msra.mxu1 %v4819_v31 }
 0x285   : > { %v2016_v41 = vmax.f32 %v1988_v4, 0.0  ;;  %v4372_v18 = vadd.f32 %v1809_v1, %v5776_v10  ;;  %v1811_v33 = vpop.f32.mrb[26].mxu0  ;;  %2343 = vmatprep.subr.bf16.mxu1 %v4824_v9 }
 0x286   : > { %v4373_v34 = vadd.f32 %v1811_v33, %v5778_v11  ;;  %v1813_v19 = vpop.f32.mrb[27].mxu0 }
 0x287   : > { %v1954_v6 = vmax.f32 %v4371_v28, %v4372_v18  ;;  %v4374_v44 = vadd.f32 %v1813_v19, %v5780_v12  ;;  %v2038_v62 = vmax.f32 %v2015_v37, %v2016_v41 }
 0x288   : > { %2344 = vmatpush1.bf16.msra.mxu1 %v4822_v27 }
 0x289   : > { %v1989_v10 = vadd.f32 %v5846_v36, %v1954_v6  ;;  %v1955_v20 = vmax.f32 %v4373_v34, %v4374_v44  ;;  %2345 = vmatprep.subr.bf16.mxu1 %v4827_v2  ;;  %v5943_v47 = vpack.c.bf16 %v2038_v62, %v2037_v53 }
 0x28b   : > { %v1990_v11 = vadd.f32 %v5846_v36, %v1955_v20  ;;  %v1817_v21 = vpop.f32.mrb[28].mxu0  ;;  %v2017_v25 = vmax.f32 %v1989_v10, 0.0 }
 0x28c   : > { %v4375_v12 = vadd.f32 %v1817_v21, %v5782_v35  ;;  %v1819_v30 = vpop.f32.mrb[29].mxu0  ;;  %2346 = vmatpush1.bf16.msra.mxu1 %v4825_v7 }
 0x28d   : > { %v2018_v50 = vmax.f32 %v1990_v11, 0.0  ;;  %v4376_v5 = vadd.f32 %v1819_v30, %v5784_v39  ;;  %v1821_v26 = vpop.f32.mrb[30].mxu0  ;;  %2347 = vmatprep.subr.bf16.mxu1 %v4830_v8 }
 0x28e   : > { %v4377_v17 = vadd.f32 %v1821_v26, %v5786_v13  ;;  %v1823_v32 = vpop.f32.mrb[31].mxu0 }
 0x28f   : > { %v1956_v35 = vmax.f32 %v4375_v12, %v4376_v5  ;;  %v4378_v53 = vadd.f32 %v1823_v32, %v5788_v14  ;;  %v2039_v31 = vmax.f32 %v2017_v25, %v2018_v50 }
 0x290   : > { %2348 = vmatpush1.bf16.msra.mxu1 %v4828_v43 }
 0x291   : > { %v1991_v22 = vadd.f32 %v5846_v36, %v1956_v35  ;;  %v1957_v3 = vmax.f32 %v4377_v17, %v4378_v53  ;;  %v5957_v9 = vpack.c.bf16 %v2039_v31, %v2038_v62  ;;  %2514 = vmatprep.subr.bf16.mxu1 %v4833_v29 }
 0x293   : > { %v1992_v39 = vadd.f32 %v5846_v36, %v1957_v3  ;;  %v1827_v4 = vpop.f32.mrb[32].mxu0  ;;  %2223 = vmatmul.mubr.bf16.gmra.mrb[64].mxu1 %v5957_v9  ;;  %v2019_v28 = vmax.f32 %v1991_v22, 0.0 }
 0x294   : > { %v4379_v38 = vadd.f32 %v1827_v4, %v5790_v15  ;;  %v1829_v13 = vpop.f32.mrb[33].mxu0  ;;  %2232 = vmatprep.mubr.bf16.mxu1 %v6503_v63 }
 0x295   : > { %v2020_v14 = vmax.f32 %v1992_v39, 0.0  ;;  %v4380_v1 = vadd.f32 %v1829_v13, %v5792_v40  ;;  %v1831_v27 = vpop.f32.mrb[34].mxu0 }
 0x296   : > { %v4381_v37 = vadd.f32 %v1831_v27, %v5794_v42  ;;  %v1833_v41 = vpop.f32.mrb[35].mxu0 }
 0x297   : > { %v1958_v18 = vmax.f32 %v4379_v38, %v4380_v1  ;;  %v4382_v33 = vadd.f32 %v1833_v41, %v5796_v16  ;;  %v2040_v2 = vmax.f32 %v2019_v28, %v2020_v14 }
 0x299   : > { %v1993_v34 = vadd.f32 %v5846_v36, %v1958_v18  ;;  %v1959_v19 = vmax.f32 %v4381_v37, %v4382_v33  ;;  %v5967_v6 = vpack.c.bf16 %v2040_v2, %v2039_v31 }
 0x29b   : > { %v1994_v15 = vadd.f32 %v5846_v36, %v1959_v19  ;;  %v1837_v44 = vpop.f32.mrb[36].mxu0  ;;  %v2021_v40 = vmax.f32 %v1993_v34, 0.0  ;;  %v6504_v19 = vld [vmem:[#allocation6_spill] sm:$0xff] }
 0x29c   : > { %v4383_v62 = vadd.f32 %v1837_v44, %v5801_v45  ;;  %v1839_v7 = vpop.f32.mrb[37].mxu0 }
 0x29d   : > { %v2022_v10 = vmax.f32 %v1994_v15, 0.0  ;;  %v4384_v42 = vadd.f32 %v1839_v7, %v5803_v46  ;;  %v1841_v20 = vpop.f32.mrb[38].mxu0 }
 0x29e   : > { %v4385_v8 = vadd.f32 %v1841_v20, %v5805_v48  ;;  %v1843_v16 = vpop.f32.mrb[39].mxu0 }
 0x29f   : > { %v1960_v11 = vmax.f32 %v4383_v62, %v4384_v42  ;;  %v4386_v21 = vadd.f32 %v1843_v16, %v5807_v49  ;;  %v2041_v12 = vmax.f32 %v2021_v40, %v2022_v10  ;;  %v6505_v62 = vld [vmem:[#allocation7_spill] sm:$0xff]  ;;  %v6506_v40 = vld [vmem:[#allocation8_spill] sm:$0xff] }
 0x2a1   : > { %v1995_v30 = vadd.f32 %v5846_v36, %v1960_v11  ;;  %v1961_v43 = vmax.f32 %v4385_v8, %v4386_v21  ;;  %v5975_v25 = vpack.c.bf16 %v2041_v12, %v2040_v2  ;;  %v6507_v8 = vld [vmem:[#allocation9_spill] sm:$0xff] }
 0x2a2   : > { %v4831_v21 = vld [vmem:[%s6481_s3 + $0x100] ss:$8 sps:$4 sm:$0xff]  }
 0x2a3   : > { %v1996_v45 = vadd.f32 %v5846_v36, %v1961_v43  ;;  %v1847_v50 = vpop.f32.mrb[40].mxu0  ;;  %2233 = vmatmul.mubr.bf16.gmra.mrb[68].mxu1 %v5975_v25  ;;  %v2023_v48 = vmax.f32 %v1995_v30, 0.0  ;;  %v4836_v43 = vld [vmem:[%s6481_s3 + $0x114] ss:$8 sps:$4 sm:$0xff]  }
 0x2a4   : > { %v4387_v46 = vadd.f32 %v1847_v50, %v5809_v51  ;;  %v1849_v5 = vpop.f32.mrb[41].mxu0  ;;  %2242 = vmatprep.mubr.bf16.mxu1 %v6503_v63 }
 0x2a5   : > { %v2024_v26 = vmax.f32 %v1996_v45, 0.0  ;;  %v4388_v49 = vadd.f32 %v1849_v5, %v5811_v52  ;;  %v1851_v29 = vpop.f32.mrb[42].mxu0  ;;  %v6508_v5 = vld [vmem:[#allocation10_spill] sm:$0xff] }
 0x2a6   : > { %v4389_v17 = vadd.f32 %v1851_v29, %v5813_v54  ;;  %v1853_v32 = vpop.f32.mrb[43].mxu0 }
 0x2a7   : > { %v1962_v35 = vmax.f32 %v4387_v46, %v4388_v49  ;;  %v4390_v53 = vadd.f32 %v1853_v32, %v5815_v55  ;;  %v2042_v31 = vmax.f32 %v2023_v48, %v2024_v26  ;;  %v4834_v49 = vld [vmem:[%s6481_s3 + $0x110] ss:$8 sps:$4 sm:$0xff]  }
 0x2a8   : > { %v6509_v32 = vld [vmem:[#allocation11_spill] sm:$0xff] }
 0x2a9   : > { %v1997_v22 = vadd.f32 %v5846_v36, %v1962_v35  ;;  %v1963_v3 = vmax.f32 %v4389_v17, %v4390_v53  ;;  %v5985_v39 = vpack.c.bf16 %v2042_v31, %v2041_v12 }
 0x2ab   : > { %v1998_v51 = vadd.f32 %v5846_v36, %v1963_v3  ;;  %v1857_v4 = vpop.f32.mrb[44].mxu0  ;;  %v2025_v52 = vmax.f32 %v1997_v22, 0.0  ;;  %v6511_v3 = vld [vmem:[#allocation13_spill] sm:$0xff] }
 0x2ac   : > { %v4391_v38 = vadd.f32 %v1857_v4, %v5817_v57  ;;  %v1859_v13 = vpop.f32.mrb[45].mxu0 }
 0x2ad   : > { %v2026_v28 = vmax.f32 %v1998_v51, 0.0  ;;  %v4392_v54 = vadd.f32 %v1859_v13, %v5819_v58  ;;  %v1861_v14 = vpop.f32.mrb[46].mxu0 }
 0x2ae   : > { %v4393_v1 = vadd.f32 %v1861_v14, %v5821_v60  ;;  %v1863_v55 = vpop.f32.mrb[47].mxu0 }
 0x2af   : > { %v1964_v27 = vmax.f32 %v4391_v38, %v4392_v54  ;;  %v4394_v37 = vadd.f32 %v1863_v55, %v5823_v61  ;;  %v2043_v41 = vmax.f32 %v2025_v52, %v2026_v28  ;;  %v4837_v38 = vld [vmem:[%s6481_s3 + $0x120] ss:$8 sps:$4 sm:$0xff]   ;;  %v4842_v28 = vld [vmem:[%s6481_s3 + $0x134] ss:$8 sps:$4 sm:$0xff]  }
 0x2b1   : > { %v1999_v18 = vadd.f32 %v5846_v36, %v1964_v27  ;;  %v1965_v33 = vmax.f32 %v4393_v1, %v4394_v37  ;;  %v5993_v2 = vpack.c.bf16 %v2043_v41, %v2042_v31  ;;  %v4840_v1 = vld [vmem:[%s6481_s3 + $0x130] ss:$8 sps:$4 sm:$0xff]   ;;  %v4845_v37 = vld [vmem:[%s6481_s3 + $0x144] ss:$8 sps:$4 sm:$0xff]  }
 0x2b3   : > { %v2000_v57 = vadd.f32 %v5846_v36, %v1965_v33  ;;  %v1867_v34 = vpop.f32.mrb[48].mxu0  ;;  %2243 = vmatmul.mubr.bf16.gmra.mrb[72].mxu1 %v5993_v2  ;;  %v2027_v60 = vmax.f32 %v1999_v18, 0.0  ;;  %v4848_v18 = vld [vmem:[%s6481_s3 + $0x154] ss:$8 sps:$4 sm:$0xff]  }
 0x2b4   : > { %v4395_v58 = vadd.f32 %v1867_v34, %v6504_v19  ;;  %v1869_v15 = vpop.f32.mrb[49].mxu0  ;;  %2365 = vmatprep.mubr.bf16.mxu1 %v6503_v63  ;;  %v4851_v34 = vld [vmem:[%s6481_s3 + $0x164] ss:$8 sps:$4 sm:$0xff]   ;;  %v4849_v19 = vld [vmem:[%s6481_s3 + $0x160] ss:$8 sps:$4 sm:$0xff]  }
 0x2b5   : > { %v2028_v44 = vmax.f32 %v2000_v57, 0.0  ;;  %v4396_v61 = vadd.f32 %v1869_v15, %v6505_v62  ;;  %v1871_v7 = vpop.f32.mrb[50].mxu0  ;;  %v4846_v57 = vld [vmem:[%s6481_s3 + $0x150] ss:$8 sps:$4 sm:$0xff]   ;;  %v4860_v62 = vld [vmem:[%s6481_s3 + $0x194] ss:$8 sps:$4 sm:$0xff]  }
 0x2b6   : > { %v4397_v10 = vadd.f32 %v1871_v7, %v6506_v40  ;;  %v1873_v42 = vpop.f32.mrb[51].mxu0  ;;  %v4852_v15 = vld [vmem:[%s6481_s3 + $0x170] ss:$8 sps:$4 sm:$0xff]   ;;  %v4863_v7 = vld [vmem:[%s6481_s3 + $0x1a4] ss:$8 sps:$4 sm:$0xff]  }
 0x2b7   : > { %v1966_v20 = vmax.f32 %v4395_v58, %v4396_v61  ;;  %v4398_v16 = vadd.f32 %v1873_v42, %v6507_v8  ;;  %v6002_v11 = vmax.f32 %v2027_v60, %v2028_v44  ;;  %v4854_v58 = vld [vmem:[%s6481_s3 + $0x174] ss:$8 sps:$4 sm:$0xff]   ;;  %v4857_v60 = vld [vmem:[%s6481_s3 + $0x184] ss:$8 sps:$4 sm:$0xff]   ;;  %v4855_v44 = vld [vmem:[%s6481_s3 + $0x180] ss:$8 sps:$4 sm:$0xff]  }
 0x2b8   : > { %v4858_v61 = vld [vmem:[%s6481_s3 + $0x190] ss:$8 sps:$4 sm:$0xff]   ;;  %v4861_v40 = vld [vmem:[%s6481_s3 + $0x1a0] ss:$8 sps:$4 sm:$0xff]   ;;  %v4869_v42 = vld [vmem:[%s6481_s3 + $0x1c4] ss:$8 sps:$4 sm:$0xff]  }
 0x2b9   : > { %v2001_v12 = vadd.f32 %v5846_v36, %v1966_v20  ;;  %v1967_v30 = vmax.f32 %v4397_v10, %v4398_v16  ;;  %v6012_v45 = vpack.c.bf16 %v6002_v11, %v2043_v41  ;;  %v4864_v10 = vld [vmem:[%s6481_s3 + $0x1b0] ss:$8 sps:$4 sm:$0xff]   ;;  %v4867_v20 = vld [vmem:[%s6481_s3 + $0x1c0] ss:$8 sps:$4 sm:$0xff]   ;;  %v4872_v8 = vld [vmem:[%s6481_s3 + $0x1d4] ss:$8 sps:$4 sm:$0xff]  }
 0x2ba   : > { %v4870_v16 = vld [vmem:[%s6481_s3 + $0x1d0] ss:$8 sps:$4 sm:$0xff]  }
 0x2bb   : > { %v2002_v50 = vadd.f32 %v5846_v36, %v1967_v30  ;;  %v1877_v46 = vpop.f32.mrb[52].mxu0  ;;  %2366 = vmatmul.mubr.bf16.vlgmr.msra.gmra.mrb[56].mxu1 %v2047_v23  ;;  %v2029_v29 = vmax.f32 %v2001_v12, 0.0  ;;  %v4873_v12 = vld [vmem:[%s6481_s3 + $0x1e0] ss:$8 sps:$4 sm:$0xff]   ;;  %v4878_v30 = vld [vmem:[%s6481_s3 + $0x1f4] ss:$8 sps:$4 sm:$0xff]  }
 0x2bc   : > { %v4399_v48 = vadd.f32 %v1877_v46, %v6508_v5  ;;  %v1879_v26 = vpop.f32.mrb[53].mxu0  ;;  %2515 = vmatpush1.bf16.msra.mxu1 %v4831_v21  ;;  %2375 = vmatprep.mubr.bf16.mxu1 %v6503_v63  ;;  %v4875_v21 = vld [vmem:[%s6481_s3 + $0x1e4] ss:$8 sps:$4 sm:$0xff]   ;;  %v4879_v46 = vld [vmem:[%s6481_s3 + $0x200] ss:$8 sps:$4 sm:$0xff]  }
 0x2bd   : > { %v2030_v17 = vmax.f32 %v2002_v50, 0.0  ;;  %v4400_v35 = vadd.f32 %v1879_v26, %v6509_v32  ;;  %v1881_v53 = vpop.f32.mrb[54].mxu0  ;;  %2516 = vmatprep.subr.bf16.mxu1 %v4836_v43  ;;  %v4876_v43 = vld [vmem:[%s6481_s3 + $0x1f0] ss:$8 sps:$4 sm:$0xff]   ;;  %v4881_v50 = vld [vmem:[%s6481_s3 + $0x204] ss:$8 sps:$4 sm:$0xff]  }
 0x2be   : > { %v4401_v23 = vadd.f32 %v1881_v53, %v6510_v0  ;;  %v1883_v31 = vpop.f32.mrb[55].mxu0  ;;  %v4884_v5 = vld [vmem:[%s6481_s3 + $0x214] ss:$8 sps:$4 sm:$0xff]   ;;  %v4887_v26 = vld [vmem:[%s6481_s3 + $0x224] ss:$8 sps:$4 sm:$0xff]  }
 0x2bf   : > { %v1968_v22 = vmax.f32 %v4399_v48, %v4400_v35  ;;  %v4402_v51 = vadd.f32 %v1883_v31, %v6511_v3  ;;  %v6029_v4 = vmax.f32 %v2029_v29, %v2030_v17  ;;  %v4882_v48 = vld [vmem:[%s6481_s3 + $0x210] ss:$8 sps:$4 sm:$0xff]   ;;  %v4893_v17 = vld [vmem:[%s6481_s3 + $0x244] ss:$8 sps:$4 sm:$0xff]   ;;  %v4891_v32 = vld [vmem:[%s6481_s3 + $0x240] ss:$8 sps:$4 sm:$0xff]  }
 0x2c0   : > { %2517 = vmatpush1.bf16.msra.mxu1 %v4834_v49  ;;  %v4885_v49 = vld [vmem:[%s6481_s3 + $0x220] ss:$8 sps:$4 sm:$0xff]   ;;  %v4888_v29 = vld [vmem:[%s6481_s3 + $0x230] ss:$8 sps:$4 sm:$0xff]   ;;  %v4899_v53 = vld [vmem:[%s6481_s3 + $0x264] ss:$8 sps:$4 sm:$0xff]  }
 0x2c1   : > { %v2003_v13 = vadd.f32 %v5846_v36, %v1968_v22  ;;  %v1969_v52 = vmax.f32 %v4401_v23, %v4402_v51  ;;  %2518 = vmatprep.subr.bf16.mxu1 %v4839_v24  ;;  %v2617_v54 = vpack.c.bf16 %v6029_v4, %v6002_v11  ;;  %v4894_v35 = vld [vmem:[%s6481_s3 + $0x250] ss:$8 sps:$4 sm:$0xff]   ;;  %v4897_v24 = vld [vmem:[%s6481_s3 + $0x260] ss:$8 sps:$4 sm:$0xff]  }
 0x2c2   : > { %v4900_v0 = vld [vmem:[%s6481_s3 + $0x270] ss:$8 sps:$4 sm:$0xff]   ;;  %v4903_v23 = vld [vmem:[%s6483_s5 + $0x40] sm:$0xff]   ;;  %v4905_v31 = vld [vmem:[%s6483_s5 + $0x48] sm:$0xff]  }
 0x2c3   : > { %v2004_v14 = vadd.f32 %v5846_v36, %v1969_v52  ;;  %2376 = vmatmul.mubr.bf16.gmra.mrb[60].mxu1 %v5901_v59  ;;  %v2031_v55 = vmax.f32 %v2003_v13, 0.0  ;;  %v4843_v36 = vld [vmem:[%s6481_s3 + $0x140] ss:$8 sps:$4 sm:$0xff]   ;;  %v4907_v22 = vld [vmem:[%s6483_s5 + $0x50] sm:$0xff]   ;;  %v4910_v51 = vld [vmem:[%s6483_s5 + $0x18] sm:$0xff]  }
 0x2c4   : > { %2519 = vmatpush1.bf16.msra.mxu1 %v4837_v38  ;;  %2385 = vmatprep.mubr.bf16.mxu1 %v6503_v63  ;;  %v4906_v11 = vld [vmem:[%s6483_s5 + $0x8] sm:$0xff]   ;;  %v4908_v3 = vld [vmem:[%s6483_s5 + $0x10] sm:$0xff]   ;;  %v4912_v38 = vld [vmem:[%s6483_s5 + $0x20] sm:$0xff]  }
 0x2c5   : > { %v2032_v27 = vmax.f32 %v2004_v14, 0.0  ;;  %2520 = vmatprep.subr.bf16.mxu1 %v4842_v28  ;;  %v4917_v13 = vld [vmem:[%s6483_s5 + $0x78] sm:$0xff]   ;;  %v4919_v28 = vld [vmem:[%s6483_s5 + $0xc0] sm:$0xff]  }
 0x2c6   : > { %v4918_v52 = vld [vmem:[%s6483_s5 + $0x38] sm:$0xff]  }
 0x2c7   : > { %v6049_v41 = vmax.f32 %v2031_v55, %v2032_v27 }
 0x2c8   : > { %2521 = vmatpush1.bf16.msra.mxu1 %v4840_v1  ;;  %v6263_v1 = vld [vmem:[%s6482_s4] ss:$0 sm:$0xff] }
 0x2c9   : > { %2522 = vmatprep.subr.bf16.mxu1 %v4845_v37  ;;  %v2818_v33 = vpack.c.bf16 %v6049_v41, %v6029_v4  ;;  %v4916_v4 = vld [vmem:[%s6483_s5 + $0x30] sm:$0xff]  }
 0x2cb   : > { %2386 = vmatmul.mubr.bf16.gmra.mrb[64].mxu1 %v5943_v47 }
 0x2cc   : > { %2523 = vmatpush1.bf16.msra.mxu1 %v4843_v36  ;;  %2395 = vmatprep.mubr.bf16.mxu1 %v6503_v63 }
 0x2cd   : > { %2524 = vmatprep.subr.bf16.mxu1 %v4848_v18 }
 0x2d0   : > { %2525 = vmatpush1.bf16.msra.mxu1 %v4846_v57 }
 0x2d1   : > { %2526 = vmatprep.subr.bf16.mxu1 %v4851_v34 }
 0x2d3   : > { %2396 = vmatmul.mubr.bf16.gmra.mrb[68].mxu1 %v5967_v6 }
 0x2d4   : > { %2405 = vmatprep.mubr.bf16.mxu1 %v6503_v63  ;;  %2527 = vmatpush1.bf16.msra.mxu1 %v4849_v19 }
 0x2d5   : > { %2528 = vmatprep.subr.bf16.mxu1 %v4854_v58 }
 0x2d8   : > { %2529 = vmatpush1.bf16.msra.mxu1 %v4852_v15 }
 0x2d9   : > { %2715 = vmatprep.subr.bf16.mxu1 %v4857_v60 }
 0x2db   : > { %2406 = vmatmul.mubr.bf16.gmra.mrb[72].mxu1 %v5985_v39 }
 0x2dc   : > { %2546 = vmatprep.mubr.bf16.mxu1 %v6503_v63 }
 0x2e3   : > { %2547 = vmatmul.mubr.bf16.vlgmr.msra.gmra.mrb[56].mxu1 %v5901_v59  ;;  %v4866_v59 = vld [vmem:[%s6481_s3 + $0x1b4] ss:$8 sps:$4 sm:$0xff]  }
 0x2e4   : > { %2716 = vmatpush1.bf16.msra.mxu1 %v4855_v44  ;;  %2556 = vmatprep.mubr.bf16.mxu1 %v6503_v63 }
 0x2e5   : > { %2717 = vmatprep.subr.bf16.mxu1 %v4860_v62 }
 0x2e8   : > { %2718 = vmatpush1.bf16.msra.mxu1 %v4858_v61 }
 0x2e9   : > { %2719 = vmatprep.subr.bf16.mxu1 %v4863_v7 }
 0x2eb   : > { %2557 = vmatmul.mubr.bf16.gmra.mrb[60].mxu1 %v5943_v47 }
 0x2ec   : > { %2720 = vmatpush1.bf16.msra.mxu1 %v4861_v40  ;;  %2566 = vmatprep.mubr.bf16.mxu1 %v6503_v63 }
 0x2ed   : > { %2721 = vmatprep.subr.bf16.mxu1 %v4866_v59 }
 0x2f0   : > { %2722 = vmatpush1.bf16.msra.mxu1 %v4864_v10 }
 0x2f1   : > { %2723 = vmatprep.subr.bf16.mxu1 %v4869_v42 }
 0x2f3   : > { %2567 = vmatmul.mubr.bf16.gmra.mrb[64].mxu1 %v5967_v6 }
 0x2f4   : > { %2724 = vmatpush1.bf16.msra.mxu1 %v4867_v20  ;;  %2576 = vmatprep.mubr.bf16.mxu1 %v6503_v63 }
 0x2f5   : > { %2725 = vmatprep.subr.bf16.mxu1 %v4872_v8 }
 0x2f8   : > { %2726 = vmatpush1.bf16.msra.mxu1 %v4870_v16 }
 0x2f9   : > { %2727 = vmatprep.subr.bf16.mxu1 %v4875_v21 }
 0x2fb   : > { %2577 = vmatmul.mubr.bf16.gmra.mrb[68].mxu1 %v5985_v39 }
 0x2fc   : > { %2586 = vmatprep.mubr.bf16.mxu1 %v6503_v63  ;;  %2728 = vmatpush1.bf16.msra.mxu1 %v4873_v12 }
 0x2fd   : > { %2729 = vmatprep.subr.bf16.mxu1 %v4878_v30 }
 0x300   : > { %2730 = vmatpush1.bf16.msra.mxu1 %v4876_v43 }
 0x301   : > { %2916 = vmatprep.subr.bf16.mxu1 %v4881_v50  ;;  %v4920_v50 = vld [vmem:[%s6483_s5 + $0x80] sm:$0xff]  }
 0x303   : > { %2587 = vmatmul.mubr.bf16.gmra.mrb[72].mxu1 %v6012_v45 }
 0x304   : > { %2747 = vmatprep.mubr.bf16.mxu1 %v6503_v63 }
 0x30b   : > { %2748 = vmatmul.mubr.bf16.vlgmr.msra.gmra.mrb[56].mxu1 %v5918_v56  ;;  %v4890_v56 = vld [vmem:[%s6481_s3 + $0x234] ss:$8 sps:$4 sm:$0xff]  }
 0x30c   : > { %2917 = vmatpush1.bf16.msra.mxu1 %v4879_v46  ;;  %2757 = vmatprep.mubr.bf16.mxu1 %v6503_v63 }
 0x30d   : > { %2918 = vmatprep.subr.bf16.mxu1 %v4884_v5  ;;  %v4921_v5 = vld [vmem:[%s6483_s5 + $0xc8] sm:$0xff]  }
 0x310   : > { %2919 = vmatpush1.bf16.msra.mxu1 %v4882_v48 }
 0x311   : > { %2920 = vmatprep.subr.bf16.mxu1 %v4887_v26 }
 0x313   : > { %2758 = vmatmul.mubr.bf16.gmra.mrb[60].mxu1 %v5957_v9  ;;  %v4896_v9 = vld [vmem:[%s6481_s3 + $0x254] ss:$8 sps:$4 sm:$0xff]  }
 0x314   : > { %2921 = vmatpush1.bf16.msra.mxu1 %v4885_v49  ;;  %2767 = vmatprep.mubr.bf16.mxu1 %v6503_v63 }
 0x315   : > { %2922 = vmatprep.subr.bf16.mxu1 %v4890_v56 }
 0x318   : > { %2923 = vmatpush1.bf16.msra.mxu1 %v4888_v29  ;;  %v4922_v29 = vld [vmem:[%s6483_s5 + $0x88] sm:$0xff]  }
 0x319   : > { %2924 = vmatprep.subr.bf16.mxu1 %v4893_v17 }
 0x31b   : > { %2768 = vmatmul.mubr.bf16.gmra.mrb[64].mxu1 %v5975_v25  ;;  %v4902_v25 = vld [vmem:[%s6481_s3 + $0x274] ss:$8 sps:$4 sm:$0xff]  }
 0x31c   : > { %2925 = vmatpush1.bf16.msra.mxu1 %v4891_v32  ;;  %2777 = vmatprep.mubr.bf16.mxu1 %v6503_v63  ;;  %v4923_v32 = vld [vmem:[%s6483_s5 + $0xd0] sm:$0xff]  }
 0x31d   : > { %2926 = vmatprep.subr.bf16.mxu1 %v4896_v9 }
 0x320   : > { %2927 = vmatpush1.bf16.msra.mxu1 %v4894_v35 }
 0x321   : > { %2928 = vmatprep.subr.bf16.mxu1 %v4899_v53 }
 0x323   : > { %2778 = vmatmul.mubr.bf16.gmra.mrb[68].mxu1 %v5993_v2  ;;  %v4904_v2 = vld [vmem:[%s6483_s5] sm:$0xff]  }
 0x324   : > { %2787 = vmatprep.mubr.bf16.mxu1 %v6503_v63  ;;  %2929 = vmatpush1.bf16.msra.mxu1 %v4897_v24 }
 0x325   : > { %2930 = vmatprep.subr.bf16.mxu1 %v4902_v25 }
 0x328   : > { %2931 = vmatpush1.bf16.msra.mxu1 %v4900_v0 }
 0x329   : > { %4216 = vmatprep.subr.bf16.mxu1 %v4903_v23  ;;  %v4924_v23 = vld [vmem:[%s6483_s5 + $0x90] sm:$0xff]  }
 0x32b   : > { %2788 = vmatmul.mubr.bf16.gmra.mrb[72].mxu1 %v2617_v54 }
 0x32c   : > { %2948 = vmatprep.mubr.bf16.mxu1 %v6503_v63 }
 0x333   : > { %2949 = vmatmul.mubr.bf16.vlgmr.msra.gmra.mrb[56].mxu1 %v5943_v47  ;;  %v4909_v47 = vld [vmem:[%s6483_s5 + $0x58] sm:$0xff]  }
 0x334   : > { %2958 = vmatprep.mubr.bf16.mxu1 %v6503_v63  ;;  %4217 = vmatpush3.bf16.msra.mxu1 %v4904_v2  ;;  %v4925_v2 = vld [vmem:[%s6483_s5 + $0xd8] sm:$0xff]  }
 0x335   : > { %4218 = vmatprep.subr.bf16.mxu1 %v4905_v31 }
 0x338   : > { %4219 = vmatpush3.bf16.msra.mxu1 %v4906_v11 }
 0x339   : > { %4220 = vmatprep.subr.bf16.mxu1 %v4907_v22 }
 0x33b   : > { %2959 = vmatmul.mubr.bf16.gmra.mrb[60].mxu1 %v5967_v6  ;;  %v4911_v6 = vld [vmem:[%s6483_s5 + $0x60] sm:$0xff]  }
 0x33c   : > { %2968 = vmatprep.mubr.bf16.mxu1 %v6503_v63  ;;  %4221 = vmatpush3.bf16.msra.mxu1 %v4908_v3 }
 0x33d   : > { %4222 = vmatprep.subr.bf16.mxu1 %v4909_v47  ;;  %v4926_v47 = vld [vmem:[%s6483_s5 + $0x98] sm:$0xff]  }
 0x340   : > { %4223 = vmatpush3.bf16.msra.mxu1 %v4910_v51 }
 0x341   : > { %4224 = vmatprep.subr.bf16.mxu1 %v4911_v6  ;;  %v4927_v6 = vld [vmem:[%s6483_s5 + $0xe0] sm:$0xff]  }
 0x343   : > { %2969 = vmatmul.mubr.bf16.gmra.mrb[64].mxu1 %v5985_v39  ;;  %v4913_v39 = vld [vmem:[%s6483_s5 + $0x68] sm:$0xff]  }
 0x344   : > { %2978 = vmatprep.mubr.bf16.mxu1 %v6503_v63  ;;  %4225 = vmatpush3.bf16.msra.mxu1 %v4912_v38 }
 0x345   : > { %4226 = vmatprep.subr.bf16.mxu1 %v4913_v39 }
 0x34b   : > { %2979 = vmatmul.mubr.bf16.gmra.mrb[68].mxu1 %v6012_v45  ;;  %v4915_v45 = vld [vmem:[%s6483_s5 + $0x70] sm:$0xff]  }
 0x34c   : > { %2988 = vmatprep.mubr.bf16.mxu1 %v6503_v63  ;;  %v4914_v63 = vld [vmem:[%s6483_s5 + $0x28] sm:$0xff]  }
 0x34d   : > { %4227 = vmatpush3.bf16.msra.mxu1 %v4914_v63 }
 0x34e   : > { %4228 = vmatprep.subr.bf16.mxu1 %v4915_v45 }
 0x351   : > { %4229 = vmatpush3.bf16.msra.mxu1 %v4916_v4 }
 0x352   : > { %4230 = vmatprep.subr.bf16.mxu1 %v4917_v13 }
 0x353   : > { %2989 = vmatmul.mubr.bf16.gmra.mrb[72].mxu1 %v2818_v33 }
 0x355   : > { %4231 = vmatpush3.bf16.msra.mxu1 %v4918_v52 }
 0x356   : > { %4238 = vmatprep.subr.bf16.mxu1 %v4919_v28  ;;  %v4928_v28 = vld [vmem:[%s6483_s5 + $0xa0] sm:$0xff]  }
 0x406   : > { %v2950_v54 = vpop.f32.mrb[56].mxu1 }
 0x407   : > { %v2952_v14 = vpop.f32.mrb[57].mxu1 }
 0x408   : > { %v3019_v55 = vmax.f32 %v2950_v54, %v2952_v14  ;;  %v2954_v27 = vpop.f32.mrb[58].mxu1  ;;  %v4929_v54 = vld [vmem:[%s6483_s5 + $0xe8] sm:$0xff]  }
 0x409   : > { %v2956_v37 = vpop.f32.mrb[59].mxu1 }
 0x40a   : > { %v3036_v41 = vadd.f32 %v6263_v1, %v3019_v55  ;;  %v3020_v36 = vmax.f32 %v2954_v27, %v2956_v37  ;;  %v4930_v37 = vld [vmem:[%s6483_s5 + $0xa8] sm:$0xff]  }
 0x40c   : > { %v3037_v18 = vadd.f32 %v6263_v1, %v3020_v36  ;;  %v3046_v33 = vmax.f32 %v3036_v41, 0.0  ;;  %v4931_v41 = vld [vmem:[%s6483_s5 + $0xf0] sm:$0xff]  }
 0x40e   : > { %v3047_v57 = vmax.f32 %v3037_v18, 0.0  ;;  %v2960_v34 = vpop.f32.mrb[60].mxu1  ;;  %v4932_v18 = vld [vmem:[%s6483_s5 + $0xb0] sm:$0xff]  }
 0x40f   : > { %v2962_v19 = vpop.f32.mrb[61].mxu1 }
 0x410   : > { %v3056_v58 = vmax.f32 %v3046_v33, %v3047_v57  ;;  %v3021_v15 = vmax.f32 %v2960_v34, %v2962_v19  ;;  %v2964_v60 = vpop.f32.mrb[62].mxu1  ;;  %v4934_v33 = vld [vmem:[%s6483_s5 + $0xb8] sm:$0xff]   ;;  %v4935_v57 = vld [vmem:[%s6483_s5 + $0x100] sm:$0xff]   ;;  %v5028_v19 = vmov 0.0  }
 0x411   : > { %v2966_v44 = vpop.f32.mrb[63].mxu1 }
 0x412   : > { %v3038_v62 = vadd.f32 %v6263_v1, %v3021_v15  ;;  %v3022_v61 = vmax.f32 %v2964_v60, %v2966_v44  ;;  %v3061_v46 = vpack.c.bf16 %v3056_v58, %v3056_v58  ;;  %v4936_v58 = vld [vmem:[%s6483_s5 + $0x108] sm:$0xff]   ;;  %v4937_v15 = vld [vmem:[%s6483_s5 + $0x110] sm:$0xff]   ;;  %v4938_v60 = vld [vmem:[%s6483_s5 + $0x118] sm:$0xff]  }
 0x413   : > { %v4939_v44 = vld [vmem:[%s6483_s5 + $0x120] sm:$0xff]  }
 0x414   : > { %v3039_v7 = vadd.f32 %v6263_v1, %v3022_v61  ;;  %v3048_v40 = vmax.f32 %v3038_v62, 0.0  ;;  %v4940_v62 = vld [vmem:[%s6483_s5 + $0x128] sm:$0xff]   ;;  %v4941_v61 = vld [vmem:[%s6483_s5 + $0x130] sm:$0xff]  }
 0x416   : > { %v3049_v59 = vmax.f32 %v3039_v7, 0.0  ;;  %v2970_v10 = vpop.f32.mrb[64].mxu1  ;;  %v4942_v7 = vld [vmem:[%s6483_s5 + $0x138] sm:$0xff]  }
 0x417   : > { %v2972_v42 = vpop.f32.mrb[65].mxu1 }
 0x418   : > { %v3023_v20 = vmax.f32 %v2970_v10, %v2972_v42  ;;  %v2974_v8 = vpop.f32.mrb[66].mxu1  ;;  %v3057_v16 = vmax.f32 %v3048_v40, %v3049_v59  ;;  %v4943_v59 = vld [vmem:[%s6485_s7] sm:$0xff]   ;;  %v4944_v10 = vld [vmem:[%s6485_s7 + $0x8] sm:$0xff]   ;;  %v4945_v42 = vld [vmem:[%s6485_s7 + $0x10] sm:$0xff]  }
 0x419   : > { %v2976_v21 = vpop.f32.mrb[67].mxu1 }
 0x41a   : > { %v3040_v12 = vadd.f32 %v6263_v1, %v3023_v20  ;;  %v3024_v30 = vmax.f32 %v2974_v8, %v2976_v21  ;;  %v3062_v43 = vpack.c.bf16 %v3057_v16, %v3057_v16  ;;  %v4946_v20 = vld [vmem:[%s6485_s7 + $0x18] sm:$0xff]   ;;  %v4947_v8 = vld [vmem:[%s6485_s7 + $0x20] sm:$0xff]   ;;  %v4948_v16 = vld [vmem:[%s6485_s7 + $0x28] sm:$0xff]  }
 0x41b   : > { %v4949_v21 = vld [vmem:[%s6485_s7 + $0x30] sm:$0xff]  }
 0x41c   : > { %v3041_v48 = vadd.f32 %v6263_v1, %v3024_v30  ;;  %3425 = vmatprep.mubr.bf16.mxu1 %v3062_v43  ;;  %v3050_v26 = vmax.f32 %v3040_v12, 0.0  ;;  %v4950_v12 = vld [vmem:[%s6485_s7 + $0x38] sm:$0xff]  }
 0x41d   : > { %3426 = vmatmul.mubr.bf16.vlgmr.msra.gmra.mrb[76].mxu1 %v3061_v46 }
 0x41e   : > { %v3051_v49 = vmax.f32 %v3041_v48, 0.0  ;;  %4239 = vmatpush3.bf16.msra.mxu1 %v4920_v50  ;;  %v2980_v56 = vpop.f32.mrb[68].mxu1  ;;  %v4153_v48 = vld [vmem:[%s6484_s6] ss:$0 sm:$0xff] }
 0x41f   : > { %v2982_v17 = vpop.f32.mrb[69].mxu1  ;;  %4240 = vmatprep.subr.bf16.mxu1 %v4921_v5 }
 0x420   : > { %v3058_v9 = vmax.f32 %v3050_v26, %v3051_v49  ;;  %v3025_v35 = vmax.f32 %v2980_v56, %v2982_v17  ;;  %v2984_v53 = vpop.f32.mrb[70].mxu1 }
 0x421   : > { %v2986_v24 = vpop.f32.mrb[71].mxu1 }
 0x422   : > { %v3042_v25 = vadd.f32 %v6263_v1, %v3025_v35  ;;  %v3026_v0 = vmax.f32 %v2984_v53, %v2986_v24  ;;  %4241 = vmatpush3.bf16.msra.mxu1 %v4922_v29  ;;  %v3063_v34 = vpack.c.bf16 %v3058_v9, %v3058_v9 }
 0x423   : > { %4242 = vmatprep.subr.bf16.mxu1 %v4923_v32 }
 0x424   : > { %v3043_v31 = vadd.f32 %v6263_v1, %v3026_v0  ;;  %v3052_v11 = vmax.f32 %v3042_v25, 0.0 }
 0x426   : > { %v3053_v22 = vmax.f32 %v3043_v31, 0.0  ;;  %4243 = vmatpush3.bf16.msra.mxu1 %v4924_v23  ;;  %v2990_v3 = vpop.f32.mrb[72].mxu1 }
 0x427   : > { %v2992_v51 = vpop.f32.mrb[73].mxu1  ;;  %4244 = vmatprep.subr.bf16.mxu1 %v4925_v2  ;;  %v4951_v2 = vld [vmem:[%s6487_s9] sm:$0xff]  }
 0x428   : > { %v3027_v38 = vmax.f32 %v2990_v3, %v2992_v51  ;;  %v2994_v39 = vpop.f32.mrb[74].mxu1  ;;  %v3059_v63 = vmax.f32 %v3052_v11, %v3053_v22  ;;  %v4952_v11 = vld [vmem:[%s6487_s9 + $0x8] sm:$0xff]   ;;  %v4953_v22 = vld [vmem:[%s6487_s9 + $0x10] sm:$0xff]   ;;  %v4954_v3 = vld [vmem:[%s6487_s9 + $0x18] sm:$0xff]  }
 0x429   : > { %v2996_v45 = vpop.f32.mrb[75].mxu1  ;;  %v4956_v51 = vld [vmem:[%s6487_s9 + $0x28] sm:$0xff]  }
 0x42a   : > { %v3044_v4 = vadd.f32 %v6263_v1, %v3027_v38  ;;  %v3028_v13 = vmax.f32 %v2994_v39, %v2996_v45  ;;  %4245 = vmatpush3.bf16.msra.mxu1 %v4926_v47  ;;  %v3064_v52 = vpack.c.bf16 %v3059_v63, %v3059_v63  ;;  %v4955_v47 = vld [vmem:[%s6487_s9 + $0x20] sm:$0xff]   ;;  %v4958_v38 = vld [vmem:[%s6487_s9 + $0x38] sm:$0xff]  }
 0x42b   : > { %4246 = vmatprep.subr.bf16.mxu1 %v4927_v6  ;;  %v4957_v6 = vld [vmem:[%s6487_s9 + $0x30] sm:$0xff]   ;;  %v4194_v39 = vld [vmem:[%s6486_s8] ss:$0 sm:$0xff] }
 0x42c   : > { %v3045_v14 = vadd.f32 %v6263_v1, %v3028_v13  ;;  %3465 = vmatprep.mubr.bf16.mxu1 %v3064_v52  ;;  %v3054_v55 = vmax.f32 %v3044_v4, 0.0  ;;  %v4933_v1 = vld [vmem:[%s6483_s5 + $0xf8] sm:$0xff]  }
 0x42e   : > { %v3055_v27 = vmax.f32 %v3045_v14, 0.0  ;;  %4247 = vmatpush3.bf16.msra.mxu1 %v4928_v28  ;;  %v4203_v14 = vld [vmem:[%s6488_s10] ss:$0 sm:$0xff] }
 0x42f   : > { %4248 = vmatprep.subr.bf16.mxu1 %v4929_v54 }
 0x430   : > { %v3060_v36 = vmax.f32 %v3054_v55, %v3055_v27 }
 0x432   : > { %4249 = vmatpush3.bf16.msra.mxu1 %v4930_v37  ;;  %v3065_v40 = vpack.c.bf16 %v3060_v36, %v3060_v36 }
 0x433   : > { %4250 = vmatprep.subr.bf16.mxu1 %v4931_v41 }
 0x436   : > { %4251 = vmatpush3.bf16.msra.mxu1 %v4932_v18 }
 0x437   : > { %4252 = vmatprep.subr.bf16.mxu1 %v4933_v1 }
 0x43a   : > { %4253 = vmatpush3.bf16.msra.mxu1 %v4934_v33 }
 0x43b   : > { %4287 = vmatprep.subr.bf16.mxu1 %v5028_v19 }
 0x43d   : > { %3466 = vmatmul.mubr.bf16.vlgmr.msra.gmra.mrb[80].mxu1 %v3063_v34 }
 0x43e   : > { %4288 = vmatpush3.bf16.msra.mxu1 %v4935_v57  ;;  %4303 = vmatprep.mubr.msk.bf16.mxu1 %vm5029_vm1, %v5028_v19 }
 0x43f   : > { %4289 = vmatprep.subr.bf16.mxu1 %v5028_v19 }
 0x442   : > { %4290 = vmatpush3.bf16.msra.mxu1 %v4936_v58 }
 0x443   : > { %4291 = vmatprep.subr.bf16.mxu1 %v5028_v19 }
 0x446   : > { %4292 = vmatpush3.bf16.msra.mxu1 %v4937_v15 }
 0x447   : > { %4293 = vmatprep.subr.bf16.mxu1 %v5028_v19 }
 0x44a   : > { %4294 = vmatpush3.bf16.msra.mxu1 %v4938_v60 }
 0x44b   : > { %4295 = vmatprep.subr.bf16.mxu1 %v5028_v19 }
 0x44e   : > { %4296 = vmatpush3.bf16.msra.mxu1 %v4939_v44 }
 0x44f   : > { %4297 = vmatprep.subr.bf16.mxu1 %v5028_v19 }
 0x452   : > { %4298 = vmatpush3.bf16.msra.mxu1 %v4940_v62 }
 0x453   : > { %4299 = vmatprep.subr.bf16.mxu1 %v5028_v19 }
 0x456   : > { %4300 = vmatpush3.bf16.msra.mxu1 %v4941_v61 }
 0x457   : > { %4301 = vmatprep.subr.bf16.mxu1 %v5028_v19 }
 0x45a   : > { %4302 = vmatpush3.bf16.msra.mxu1 %v4942_v7 }
 0x45b   : > { %4307 = vmatprep.subr.bf16.mxu1 %v5028_v19 }
 0x45d   : > { %4304 = vmatmul.mubr.bf16.vlgmr.msra.gmra.mrb[84].mxu1 %v3065_v40 }
 0x45e   : > { %4323 = vmatprep.mubr.msk.bf16.mxu1 %vm5029_vm1, %v5028_v19  ;;  %4308 = vmatpush3.bf16.msra.mxu1 %v4943_v59 }
 0x45f   : > { %4309 = vmatprep.subr.bf16.mxu1 %v5028_v19 }
 0x462   : > { %4310 = vmatpush3.bf16.msra.mxu1 %v4944_v10 }
 0x463   : > { %4311 = vmatprep.subr.bf16.mxu1 %v5028_v19 }
 0x466   : > { %4312 = vmatpush3.bf16.msra.mxu1 %v4945_v42 }
 0x467   : > { %4313 = vmatprep.subr.bf16.mxu1 %v5028_v19 }
 0x46a   : > { %4314 = vmatpush3.bf16.msra.mxu1 %v4946_v20 }
 0x46b   : > { %4315 = vmatprep.subr.bf16.mxu1 %v5028_v19 }
 0x46e   : > { %4316 = vmatpush3.bf16.msra.mxu1 %v4947_v8 }
 0x46f   : > { %4317 = vmatprep.subr.bf16.mxu1 %v5028_v19 }
 0x472   : > { %4318 = vmatpush3.bf16.msra.mxu1 %v4948_v16 }
 0x473   : > { %4319 = vmatprep.subr.bf16.mxu1 %v5028_v19 }
 0x476   : > { %4320 = vmatpush3.bf16.msra.mxu1 %v4949_v21 }
 0x477   : > { %4321 = vmatprep.subr.bf16.mxu1 %v5028_v19 }
 0x47a   : > { %4322 = vmatpush3.bf16.msra.mxu1 %v4950_v12 }
 0x47b   : > { %4327 = vmatprep.subr.bf16.mxu1 %v5028_v19 }
 0x4f0   : > { %v4232_v30 = vpop.f32.mrb[76].mxu1 }
 0x4f1   : > { %v4233_v43 = vpop.f32.mrb[77].mxu1 }
 0x4f2   : > { %v4234_v50 = vadd.f32 %v4233_v43, %v4232_v30  ;;  %v4235_v46 = vpop.f32.mrb[78].mxu1 }
 0x4f3   : > { %v4236_v5 = vpop.f32.mrb[79].mxu1 }
 0x4f4   : > { %v3428_v56 = vadd.f32 %v4234_v50, %v4153_v48 }
 0x510   : > { %v4254_v26 = vpop.f32.mrb[80].mxu1 }
 0x511   : > { %v4255_v49 = vpop.f32.mrb[81].mxu1 }
 0x512   : > { %v4256_v29 = vadd.f32 %v4255_v49, %v4254_v26  ;;  %v4257_v17 = vpop.f32.mrb[82].mxu1 }
 0x513   : > { %v4258_v32 = vpop.f32.mrb[83].mxu1 }
 0x514   : > { %v3468_v9 = vadd.f32 %v4256_v29, %v3428_v56 }
 0x530   : > { %v3507_v35 = vpop.f32.mrb[84].mxu1 }
 0x531   : > { %v3508_v53 = vadd.f32 %v3507_v35, %v3468_v9  ;;  %v4305_v24 = vpop.f32.mrb[85].mxu1 }
 0x532   : > { %v3510_v25 = vpop.f32.mrb[86].mxu1 }
 0x533   : > { %v3513_v0 = vmax.f32 %v3508_v53, 0.0  ;;  %v4306_v23 = vpop.f32.mrb[87].mxu1 }
 0x535   : > { %v3514_v31 = vpack.c.bf16 %v3513_v0, %v3513_v0 }
 0x537   : > { %4324 = vmatmul.mubr.bf16.vlgmr.msra.gmra.mrb[88].mxu1 %v3514_v31 }
 0x538   : > { %4328 = vmatpush3.bf16.msra.mxu1 %v4951_v2  ;;  %4343 = vmatprep.mubr.msk.bf16.mxu1 %vm5029_vm1, %v5028_v19 }
 0x539   : > { %4329 = vmatprep.subr.bf16.mxu1 %v5028_v19 }
 0x53c   : > { %4330 = vmatpush3.bf16.msra.mxu1 %v4952_v11 }
 0x53d   : > { %4331 = vmatprep.subr.bf16.mxu1 %v5028_v19 }
 0x540   : > { %4332 = vmatpush3.bf16.msra.mxu1 %v4953_v22 }
 0x541   : > { %4333 = vmatprep.subr.bf16.mxu1 %v5028_v19 }
 0x544   : > { %4334 = vmatpush3.bf16.msra.mxu1 %v4954_v3 }
 0x545   : > { %4335 = vmatprep.subr.bf16.mxu1 %v5028_v19 }
 0x548   : > { %4336 = vmatpush3.bf16.msra.mxu1 %v4955_v47 }
 0x549   : > { %4337 = vmatprep.subr.bf16.mxu1 %v5028_v19 }
 0x54c   : > { %4338 = vmatpush3.bf16.msra.mxu1 %v4956_v51 }
 0x54d   : > { %4339 = vmatprep.subr.bf16.mxu1 %v5028_v19 }
 0x550   : > { %4340 = vmatpush3.bf16.msra.mxu1 %v4957_v6 }
 0x551   : > { %4341 = vmatprep.subr.bf16.mxu1 %v5028_v19 }
 0x554   : > { %4342 = vmatpush3.bf16.msra.mxu1 %v4958_v38 }
 0x60a   : > { %v3620_v63 = vpop.f32.mrb[88].mxu1 }
 0x60b   : > { %v3621_v45 = vadd.f32 %v4194_v39, %v3620_v63  ;;  %v4325_v4 = vpop.f32.mrb[89].mxu1 }
 0x60c   : > { %v3623_v13 = vpop.f32.mrb[90].mxu1 }
 0x60d   : > { %v3626_v52 = vmax.f32 %v3621_v45, 0.0  ;;  %v4326_v28 = vpop.f32.mrb[91].mxu1 }
 0x60f   : > { %v3627_v54 = vpack.c.bf16 %v3626_v52, %v3626_v52 }
 0x611   : > { %4344 = vmatmul.mubr.bf16.vlgmr.msra.gmra.mrb[92].mxu1 %v3627_v54 }
 0x6e4   : > { %v3733_v55 = vpop.f32.mrb[92].mxu1 }
 0x6e5   : > { %v3734_v27 = vadd.f32 %v4203_v14, %v3733_v55  ;;  %v4345_v37 = vpop.f32.mrb[93].mxu1 }
 0x6e6   : > { %v3736_v41 = vpop.f32.mrb[94].mxu1 }
 0x6e7   : > { %3739 = vmax.xlane.f32.xlu0 %v3734_v27  ;;  %v4346_v36 = vpop.f32.mrb[95].mxu1 }
 0x774   : > { %v3740_v18 = vpop.xlane.xlu0 %3739 }
 0x775   : > { %v3741_v1 = vsub.f32 %v3734_v27, %v3740_v18 }
 0x777   : > { %v3742_v33 = vmul.f32 1.442695, %v3741_v1 }
 0x779   : > { %4959 = vpow2.f32 %v3742_v33 }
 0x783   : > { %v4960_v57 = vpop.eup %4959 }
 0x784   : > { %3744 = vadd.xlane.f32.xlu0 %v4960_v57 }
 0x811   : > { %v3745_v34 = vpop.xlane.xlu0 %3744 }
 0x812   : > { %4961 = vrcp.f32 %v3745_v34 }
 0x81c   : > { %v4962_v19 = vpop.eup %4961 }
 0x81d   : > { %v3747_v58 = vmul.f32 %v4962_v19, %v4960_v57 }
 0x81f   : > { %3748 = vst [vmem:[%s380_s15] sm:$0xff] %v3747_v58 }
 0x820   : > { %4976 = shalt.err (!%p4973_p3)
}
 0x821   : > { %s4977_s26 = scalar_lea.hbm %s6436_s12, 128  ;;  %s4981_s22 = scalar_lea.hbm %s6489_s11, 256 }
 0x822   : > { %p4978_p4 = scmp.ne.s32.totalorder %s6436_s12, %s4977_s26  ;;  %p4982_p9 = scmp.lt.u32.totalorder %s6436_s12, %s6489_s11 }
 0x823   : > { %p4983_p10 = scmp.lt.u32.totalorder %s4981_s22, %s4977_s26  ;;  %p4985_p12 = scmp.lt.u32.totalorder %s4977_s26, %s6436_s12 }
 0x824   : > { %p4979_p7 = pnand %p4978_p4, %p5129_p5 }
 0x825   : > { %p4984_p11 = por %p4983_p10, %p4982_p9 }
 0x826   : > { %p4980_p8 = pneg %p4979_p7 }
 0x827   : > { %p4986_p13 = por %p4985_p12, %p4984_p11 }
 0x829   : > { %p4987_p0 = pnand %p4986_p13, %p4980_p8 }
 0x82b   : > { %4990 = shalt.err (!%p4987_p0)
}
 0x82c   : > { %4651 = dma.vmem_to_hbm [thread:$0]  (%p5129_p5), %s6438_s16, 128, %s6436_s12, %s3750_s25  }
 0x82d PF: > { %p4657_p1 = scmp.ge.s32.totalorder %s5025_s20, 2  ;;  %s3775_s29 = sand.u32 1, %s5013_s17  }
 0x82e   : > { %s3776_s13 = scalar_lea.sflag [#allocation3], %s3775_s29 }
 0x82f   : > { %p4654_p2 = pnand %p4657_p1, %p5133_p6 }
 0x831   : > { %5008 = dma.done.wait (!%p4654_p2), %s3776_s13, 128  }
 0x832   : > { %5010 = vsyncadd (!%p4654_p2), %s3776_s13, 4294967168  ;;  %s6512_s30 = sld [smem:[#allocation5_spill]]  ;;  %p21_p3 = scmp.ge.s32.totalorder %s5116_s23, 4  }
 0x833   : > { %s6513_s17 = smov %s5017_s18  ;;  %s6514_s18 = smov %s5021_s19 }
 0x834   : > { %s6516_s20 = smov %s5116_s23  ;;  %23 = sbr.rel (!%p21_p3) target bundleno = 3 (0x3), region = 107 }
 0x838   : > { %s6515_s19 = smov %s6512_s30 }
 0x83b   :  { %3781 = vsyncpa [#allocation3], 1 }
 0x83c   :  { %3783 = vsyncpa [#allocation3 + $0x1], 1 }

</bundles_post_ra>
